<compile_context>
chip_gen: v5e
topology: v5e:2x2
jax: 0.10.0
libtpu: 0.0.40
codegen_flags: <defaults>
</compile_context>

<pallas_src>
import math

import jax
import jax.numpy as jnp
from jax import lax
from jax.experimental import pallas as pl
from jax.experimental.pallas import tpu as pltpu


# Conv2 reads conv1-output row t = 2*oh2 + i - 1.  Writing t = 2*r' + p':
#   kernel row offset i -> source parity block p' = _PSRC[i], r' = oh2 + _DI[i]
#   (zero contribution when oh2 + _DI[i] < 0, handled by the selection matrices).
_PSRC = (1, 0, 1)
_DI = (-1, 0, 0)


# ----------------------------------------------------------------------------
# Fused Pallas kernel: conv1(3x3,s2,p1)+ReLU -> conv2(3x3,s2,p1)+ReLU
# ----------------------------------------------------------------------------

def _fused_backbone_kernel(x_ref, w1_ref, b1_ref, w2_ref, b2_ref, t_ref, o_ref):
    """One batch element, everything VMEM-resident.

    x_ref : (1, 5, 5, M, Cin) phase-grouped padded input:
            x_ref[0, a, b, r*Wc + c, ci] == x_pad[4*r + a, 4*c + b, ci]
    w1_ref: (3, 3, Cin, C1)   b1_ref: (1, C1)
    w2_ref: (3, 3, C1, C2)    b2_ref: (1, C2)
    t_ref : (3, 3, M, M)      conv2 selection matrices (stride-2 + zero-pad gather
                              out of the parity-grouped conv1 output).
    o_ref : (1, M, C2)        rows ordered (oh2, ow2), M = Ho2*Wo2.
    """
    C1 = w1_ref.shape[-1]
    C2 = w2_ref.shape[-1]
    M = o_ref.shape[-2]

    # ---- conv1: output rows grouped by (row parity p, col parity q).
    # Block (p, q) row r*Wc + c holds out1[2r+p, 2c+q, :].
    hb = [[None, None], [None, None]]
    for p in range(2):
        for q in range(2):
            acc = jnp.zeros((M, C1), dtype=jnp.float32)
            for i in range(3):
                for j in range(3):
                    patch = x_ref[0, 2 * p + i, 2 * q + j]          # (M, Cin)
                    acc = acc + jnp.dot(patch, w1_ref[i, j],
                                        preferred_element_type=jnp.float32)
            hb[p][q] = jnp.maximum(acc + b1_ref[...], 0.0)          # (M, C1)

    # ---- conv2: per kernel offset (i, j), gather the shifted / zero-padded rows
    # from the right parity block with a tiny constant matmul, then hit the MXU.
    acc2 = jnp.zeros((M, C2), dtype=jnp.float32)
    for i in range(3):
        for j in range(3):
            src = hb[_PSRC[i]][_PSRC[j]]                            # (M, C1)
            patch = jnp.dot(t_ref[i, j], src,
                            preferred_element_type=jnp.float32)     # (M, C1)
            acc2 = acc2 + jnp.dot(patch, w2_ref[i, j],
                                  preferred_element_type=jnp.float32)
    o_ref[0] = jnp.maximum(acc2 + b2_ref[...], 0.0)                 # (M, C2)


# ----------------------------------------------------------------------------
# Wrapper glue (tiny one-time XLA layout prep + mask addressing)
# ----------------------------------------------------------------------------

def _phase_group_input(x_nhwc):
    """[B,H,W,Cin] -> [B,5,5,(H//4)*(W//4),Cin] with
    out[b, a, d, r*(W//4)+c, ci] = x_pad[b, 4*r + a, 4*c + d, ci],
    where x_pad is the conv (pad=1) zero-padded input.  Same-order-of-magnitude
    size as the raw input (no 9x im2col expansion)."""
    B, H, W, Cin = x_nhwc.shape
    assert H % 4 == 0 and W % 4 == 0
    R, C = H // 4, W // 4
    xp = jnp.pad(x_nhwc, ((0, 0), (1, 1), (1, 1), (0, 0)))          # (B,H+2,W+2,Cin)
    ridx = jnp.arange(5)[:, None] + 4 * jnp.arange(R)[None, :]      # (5, R)
    cidx = jnp.arange(5)[:, None] + 4 * jnp.arange(C)[None, :]      # (5, C)
    g = xp[:, ridx]                                                 # (B,5,R,W+2,Cin)
    g = g[:, :, :, cidx, :]                                         # (B,5,R,5,C,Cin)
    g = jnp.transpose(g, (0, 1, 3, 2, 4, 5))                        # (B,5,5,R,C,Cin)
    return g.reshape(B, 5, 5, R * C, Cin)


def _shift_matrix(d, n):
    """S[m, s] = 1 iff s == m + d (rows with m + d < 0 are all-zero)."""
    o = jnp.arange(n)
    return (o[None, :] == o[:, None] + d).astype(jnp.float32)


def _conv2_selectors(R, C):
    """(3,3,R*C,R*C) selection matrices realizing conv2's stride-2 row/col gather
    (with zero padding at the border) out of the parity-grouped conv1 output."""
    rows = []
    for i in range(3):
        cols = []
        for j in range(3):
            cols.append(jnp.kron(_shift_matrix(_DI[i], R), _shift_matrix(_DI[j], C)))
        rows.append(jnp.stack(cols))
    return jnp.stack(rows)


def backbone_base_forward(tensors_nchw, mask_bhw, params):
    """Pallas equivalent of BackboneBase.forward (return_interm_layers=False).

    tensors_nchw: [B, Cin, H, W] float32, mask_bhw: [B, H, W] bool.
    Returns {'0': (feature_nchw, mask)} with feature [B, num_channels, H/4, W/4].
    """
    B, Cin, H, W = tensors_nchw.shape
    C1 = params["b1"].shape[0]
    C2 = params["b2"].shape[0]
    R, Cc = H // 4, W // 4
    M = R * Cc

    x_nhwc = jnp.transpose(tensors_nchw, (0, 2, 3, 1))
    xg = _phase_group_input(x_nhwc)                                  # (B,5,5,M,Cin)
    t_sel = _conv2_selectors(R, Cc)                                  # (3,3,M,M)
    b1 = params["b1"].reshape(1, C1)
    b2 = params["b2"].reshape(1, C2)

    feat2d = pl.pallas_call(
        _fused_backbone_kernel,
        out_shape=jax.ShapeDtypeStruct((B, M, C2), jnp.float32),
        grid=(B,),
        in_specs=[
            pl.BlockSpec((1, 5, 5, M, Cin), lambda b: (b, 0, 0, 0, 0)),
            pl.BlockSpec((3, 3, Cin, C1), lambda b: (0, 0, 0, 0)),
            pl.BlockSpec((1, C1), lambda b: (0, 0)),
            pl.BlockSpec((3, 3, C1, C2), lambda b: (0, 0, 0, 0)),
            pl.BlockSpec((1, C2), lambda b: (0, 0)),
            pl.BlockSpec((3, 3, M, M), lambda b: (0, 0, 0, 0)),
        ],
        out_specs=pl.BlockSpec((1, M, C2), lambda b: (b, 0, 0)),
        compiler_params=pltpu.CompilerParams(dimension_semantics=("parallel",)),
    )(xg, params["w1"], b1, params["w2"], b2, t_sel)

    feat = feat2d.reshape(B, R, Cc, C2).transpose(0, 3, 1, 2)        # NCHW, ~4 KB

    # Mask: F.interpolate(mask[None].float(), size=(oh,ow)).to(bool)[0] with the
    # PyTorch 'nearest' floor rule.  Pure addressing -> left to plain JAX per the
    # perf review (no kernel launch, no float round trip).
    oh, ow = feat.shape[-2:]
    ih = jnp.floor(jnp.arange(oh) * (H / oh)).astype(jnp.int32)
    iw = jnp.floor(jnp.arange(ow) * (W / ow)).astype(jnp.int32)
    mask = mask_bhw[:, ih][:, :, iw]
    return {"0": (feat, mask)}


# ----------------------------------------------------------------------------
# Deterministic setup + pure-JAX reference + run
# ----------------------------------------------------------------------------

def init_params(key, cin, c1, num_channels):
    k1, k2 = jax.random.split(key)
    w1 = jax.random.normal(k1, (3, 3, cin, c1), jnp.float32) * math.sqrt(2.0 / (9 * cin))
    b1 = jnp.zeros((c1,), jnp.float32)
    w2 = jax.random.normal(k2, (3, 3, c1, num_channels), jnp.float32) * math.sqrt(2.0 / (9 * c1))
    b2 = jnp.zeros((num_channels,), jnp.float32)
    return {"w1": w1, "b1": b1, "w2": w2, "b2": b2}


def _reference_forward(tensors_nchw, mask_bhw, params):
    """Pure-JAX reference for correctness check."""
    x = jnp.transpose(tensors_nchw, (0, 2, 3, 1))
    for w, b in ((params["w1"], params["b1"]), (params["w2"], params["b2"])):
        x = lax.conv_general_dilated(
            x, w, window_strides=(2, 2), padding=((1, 1), (1, 1)),
            dimension_numbers=("NHWC", "HWIO", "NHWC"))
        x = jnp.maximum(x + b, 0.0)
    feat = jnp.transpose(x, (0, 3, 1, 2))
    B, H, W = mask_bhw.shape
    oh, ow = feat.shape[-2:]
    ih = jnp.floor(jnp.arange(oh) * (H / oh)).astype(jnp.int32)
    iw = jnp.floor(jnp.arange(ow) * (W / ow)).astype(jnp.int32)
    mask = mask_bhw[:, ih][:, :, iw]
    return feat, mask


if __name__ == "__main__":
    B, Cin, H, W = 2, 4, 16, 16
    C1, NUM_CHANNELS = 16, 32

    key = jax.random.PRNGKey(0)
    kp, kx = jax.random.split(key)
    params = init_params(kp, Cin, C1, NUM_CHANNELS)

    tensors = jax.random.normal(kx, (B, Cin, H, W), jnp.float32)
    # Padding-style mask (True = padded region), as in NestedTensor.
    mask = jnp.zeros((B, H, W), jnp.bool_)
    mask = mask.at[0, :, 12:].set(True)   # image 0: right 4 columns padded
    mask = mask.at[1, 10:, :].set(True)   # image 1: bottom 6 rows padded

    out = backbone_base_forward(tensors, mask, params)
    feat, out_mask = out["0"]
    jax.block_until_ready(feat)
    jax.block_until_ready(out_mask)

    # Correctness check vs pure-JAX reference.
    ref_feat, ref_mask = _reference_forward(tensors, mask, params)
    assert feat.shape == (B, NUM_CHANNELS, H // 4, W // 4), feat.shape
    assert out_mask.shape == (B, H // 4, W // 4), out_mask.shape
    assert out_mask.dtype == jnp.bool_
    assert jnp.allclose(feat, ref_feat, atol=1e-4, rtol=1e-4)
    assert bool(jnp.all(out_mask == ref_mask))

    print("KERNEL_OK")
</pallas_src>

<mosaic_0001>
module attributes {stable_mosaic.version = 11 : i64} {
  func.func @_fused_backbone_kernel(%arg0: i32, %arg1: memref<1x5x5x16x4xf32, #tpu.memory_space<vmem>>, %arg2: memref<3x3x4x16xf32, #tpu.memory_space<vmem>>, %arg3: memref<1x16xf32, #tpu.memory_space<vmem>>, %arg4: memref<3x3x16x32xf32, #tpu.memory_space<vmem>>, %arg5: memref<1x32xf32, #tpu.memory_space<vmem>>, %arg6: memref<3x3x16x16xf32, #tpu.memory_space<vmem>>, %arg7: memref<1x16x32xf32, #tpu.memory_space<vmem>>) attributes {dimension_semantics = [#tpu.dimension_semantics<parallel>], iteration_bounds = array<i64: 2>, scalar_prefetch = 0 : i64, scratch_operands = 0 : i64, tpu.core_type = #tpu.core_type<tc>, window_params = [{transform_indices = @transform_0, window_bounds = array<i64: 1, 5, 5, 16, 4>}, {pipeline_mode = #tpu.pipeline_mode<synchronous>, transform_indices = @transform_1, window_bounds = array<i64: 3, 3, 4, 16>}, {pipeline_mode = #tpu.pipeline_mode<synchronous>, transform_indices = @transform_2, window_bounds = array<i64: 1, 16>}, {pipeline_mode = #tpu.pipeline_mode<synchronous>, transform_indices = @transform_3, window_bounds = array<i64: 3, 3, 16, 32>}, {pipeline_mode = #tpu.pipeline_mode<synchronous>, transform_indices = @transform_4, window_bounds = array<i64: 1, 32>}, {pipeline_mode = #tpu.pipeline_mode<synchronous>, transform_indices = @transform_5, window_bounds = array<i64: 3, 3, 16, 16>}, {transform_indices = @transform_6, window_bounds = array<i64: 1, 16, 32>}]} {
    %cst = arith.constant 0.000000e+00 : f32
    %0 = vector.broadcast %cst : f32 to vector<16x16xf32>
    %c0 = arith.constant 0 : index
    %c0_0 = arith.constant 0 : index
    %c0_1 = arith.constant 0 : index
    %c0_2 = arith.constant 0 : index
    %c0_3 = arith.constant 0 : index
    %1 = vector.load %arg1[%c0, %c0_0, %c0_1, %c0_2, %c0_3] : memref<1x5x5x16x4xf32, #tpu.memory_space<vmem>>, vector<1x1x1x16x4xf32>
    %2 = vector.shape_cast %1 : vector<1x1x1x16x4xf32> to vector<16x4xf32>
    %c0_4 = arith.constant 0 : index
    %c0_5 = arith.constant 0 : index
    %c0_6 = arith.constant 0 : index
    %c0_7 = arith.constant 0 : index
    %3 = vector.load %arg2[%c0_4, %c0_5, %c0_6, %c0_7] : memref<3x3x4x16xf32, #tpu.memory_space<vmem>>, vector<1x1x4x16xf32>
    %4 = vector.shape_cast %3 : vector<1x1x4x16xf32> to vector<4x16xf32>
    %cst_8 = arith.constant dense<0.000000e+00> : vector<16x16xf32>
    %5 = tpu.matmul %2, %4, %cst_8 {dimension_numbers = #tpu.dot_dimension_numbers<[1], [0], [0], [1], [0, 0, 1, 1], [], []>} : vector<16x4xf32>, vector<4x16xf32>, vector<16x16xf32> -> vector<16x16xf32>
    %6 = arith.addf %0, %5 : vector<16x16xf32>
    %c0_9 = arith.constant 0 : index
    %c0_10 = arith.constant 0 : index
    %c1 = arith.constant 1 : index
    %c0_11 = arith.constant 0 : index
    %c0_12 = arith.constant 0 : index
    %7 = vector.load %arg1[%c0_9, %c0_10, %c1, %c0_11, %c0_12] : memref<1x5x5x16x4xf32, #tpu.memory_space<vmem>>, vector<1x1x1x16x4xf32>
    %8 = vector.shape_cast %7 : vector<1x1x1x16x4xf32> to vector<16x4xf32>
    %c0_13 = arith.constant 0 : index
    %c1_14 = arith.constant 1 : index
    %c0_15 = arith.constant 0 : index
    %c0_16 = arith.constant 0 : index
    %9 = vector.load %arg2[%c0_13, %c1_14, %c0_15, %c0_16] : memref<3x3x4x16xf32, #tpu.memory_space<vmem>>, vector<1x1x4x16xf32>
    %10 = vector.shape_cast %9 : vector<1x1x4x16xf32> to vector<4x16xf32>
    %cst_17 = arith.constant dense<0.000000e+00> : vector<16x16xf32>
    %11 = tpu.matmul %8, %10, %cst_17 {dimension_numbers = #tpu.dot_dimension_numbers<[1], [0], [0], [1], [0, 0, 1, 1], [], []>} : vector<16x4xf32>, vector<4x16xf32>, vector<16x16xf32> -> vector<16x16xf32>
    %12 = arith.addf %6, %11 : vector<16x16xf32>
    %c0_18 = arith.constant 0 : index
    %c0_19 = arith.constant 0 : index
    %c2 = arith.constant 2 : index
    %c0_20 = arith.constant 0 : index
    %c0_21 = arith.constant 0 : index
    %13 = vector.load %arg1[%c0_18, %c0_19, %c2, %c0_20, %c0_21] : memref<1x5x5x16x4xf32, #tpu.memory_space<vmem>>, vector<1x1x1x16x4xf32>
    %14 = vector.shape_cast %13 : vector<1x1x1x16x4xf32> to vector<16x4xf32>
    %c0_22 = arith.constant 0 : index
    %c2_23 = arith.constant 2 : index
    %c0_24 = arith.constant 0 : index
    %c0_25 = arith.constant 0 : index
    %15 = vector.load %arg2[%c0_22, %c2_23, %c0_24, %c0_25] : memref<3x3x4x16xf32, #tpu.memory_space<vmem>>, vector<1x1x4x16xf32>
    %16 = vector.shape_cast %15 : vector<1x1x4x16xf32> to vector<4x16xf32>
    %cst_26 = arith.constant dense<0.000000e+00> : vector<16x16xf32>
    %17 = tpu.matmul %14, %16, %cst_26 {dimension_numbers = #tpu.dot_dimension_numbers<[1], [0], [0], [1], [0, 0, 1, 1], [], []>} : vector<16x4xf32>, vector<4x16xf32>, vector<16x16xf32> -> vector<16x16xf32>
    %18 = arith.addf %12, %17 : vector<16x16xf32>
    %c0_27 = arith.constant 0 : index
    %c1_28 = arith.constant 1 : index
    %c0_29 = arith.constant 0 : index
    %c0_30 = arith.constant 0 : index
    %c0_31 = arith.constant 0 : index
    %19 = vector.load %arg1[%c0_27, %c1_28, %c0_29, %c0_30, %c0_31] : memref<1x5x5x16x4xf32, #tpu.memory_space<vmem>>, vector<1x1x1x16x4xf32>
    %20 = vector.shape_cast %19 : vector<1x1x1x16x4xf32> to vector<16x4xf32>
    %c1_32 = arith.constant 1 : index
    %c0_33 = arith.constant 0 : index
    %c0_34 = arith.constant 0 : index
    %c0_35 = arith.constant 0 : index
    %21 = vector.load %arg2[%c1_32, %c0_33, %c0_34, %c0_35] : memref<3x3x4x16xf32, #tpu.memory_space<vmem>>, vector<1x1x4x16xf32>
    %22 = vector.shape_cast %21 : vector<1x1x4x16xf32> to vector<4x16xf32>
    %cst_36 = arith.constant dense<0.000000e+00> : vector<16x16xf32>
    %23 = tpu.matmul %20, %22, %cst_36 {dimension_numbers = #tpu.dot_dimension_numbers<[1], [0], [0], [1], [0, 0, 1, 1], [], []>} : vector<16x4xf32>, vector<4x16xf32>, vector<16x16xf32> -> vector<16x16xf32>
    %24 = arith.addf %18, %23 : vector<16x16xf32>
    %c0_37 = arith.constant 0 : index
    %c1_38 = arith.constant 1 : index
    %c1_39 = arith.constant 1 : index
    %c0_40 = arith.constant 0 : index
    %c0_41 = arith.constant 0 : index
    %25 = vector.load %arg1[%c0_37, %c1_38, %c1_39, %c0_40, %c0_41] : memref<1x5x5x16x4xf32, #tpu.memory_space<vmem>>, vector<1x1x1x16x4xf32>
    %26 = vector.shape_cast %25 : vector<1x1x1x16x4xf32> to vector<16x4xf32>
    %c1_42 = arith.constant 1 : index
    %c1_43 = arith.constant 1 : index
    %c0_44 = arith.constant 0 : index
    %c0_45 = arith.constant 0 : index
    %27 = vector.load %arg2[%c1_42, %c1_43, %c0_44, %c0_45] : memref<3x3x4x16xf32, #tpu.memory_space<vmem>>, vector<1x1x4x16xf32>
    %28 = vector.shape_cast %27 : vector<1x1x4x16xf32> to vector<4x16xf32>
    %cst_46 = arith.constant dense<0.000000e+00> : vector<16x16xf32>
    %29 = tpu.matmul %26, %28, %cst_46 {dimension_numbers = #tpu.dot_dimension_numbers<[1], [0], [0], [1], [0, 0, 1, 1], [], []>} : vector<16x4xf32>, vector<4x16xf32>, vector<16x16xf32> -> vector<16x16xf32>
    %30 = arith.addf %24, %29 : vector<16x16xf32>
    %c0_47 = arith.constant 0 : index
    %c1_48 = arith.constant 1 : index
    %c2_49 = arith.constant 2 : index
    %c0_50 = arith.constant 0 : index
    %c0_51 = arith.constant 0 : index
    %31 = vector.load %arg1[%c0_47, %c1_48, %c2_49, %c0_50, %c0_51] : memref<1x5x5x16x4xf32, #tpu.memory_space<vmem>>, vector<1x1x1x16x4xf32>
    %32 = vector.shape_cast %31 : vector<1x1x1x16x4xf32> to vector<16x4xf32>
    %c1_52 = arith.constant 1 : index
    %c2_53 = arith.constant 2 : index
    %c0_54 = arith.constant 0 : index
    %c0_55 = arith.constant 0 : index
    %33 = vector.load %arg2[%c1_52, %c2_53, %c0_54, %c0_55] : memref<3x3x4x16xf32, #tpu.memory_space<vmem>>, vector<1x1x4x16xf32>
    %34 = vector.shape_cast %33 : vector<1x1x4x16xf32> to vector<4x16xf32>
    %cst_56 = arith.constant dense<0.000000e+00> : vector<16x16xf32>
    %35 = tpu.matmul %32, %34, %cst_56 {dimension_numbers = #tpu.dot_dimension_numbers<[1], [0], [0], [1], [0, 0, 1, 1], [], []>} : vector<16x4xf32>, vector<4x16xf32>, vector<16x16xf32> -> vector<16x16xf32>
    %36 = arith.addf %30, %35 : vector<16x16xf32>
    %c0_57 = arith.constant 0 : index
    %c2_58 = arith.constant 2 : index
    %c0_59 = arith.constant 0 : index
    %c0_60 = arith.constant 0 : index
    %c0_61 = arith.constant 0 : index
    %37 = vector.load %arg1[%c0_57, %c2_58, %c0_59, %c0_60, %c0_61] : memref<1x5x5x16x4xf32, #tpu.memory_space<vmem>>, vector<1x1x1x16x4xf32>
    %38 = vector.shape_cast %37 : vector<1x1x1x16x4xf32> to vector<16x4xf32>
    %c2_62 = arith.constant 2 : index
    %c0_63 = arith.constant 0 : index
    %c0_64 = arith.constant 0 : index
    %c0_65 = arith.constant 0 : index
    %39 = vector.load %arg2[%c2_62, %c0_63, %c0_64, %c0_65] : memref<3x3x4x16xf32, #tpu.memory_space<vmem>>, vector<1x1x4x16xf32>
    %40 = vector.shape_cast %39 : vector<1x1x4x16xf32> to vector<4x16xf32>
    %cst_66 = arith.constant dense<0.000000e+00> : vector<16x16xf32>
    %41 = tpu.matmul %38, %40, %cst_66 {dimension_numbers = #tpu.dot_dimension_numbers<[1], [0], [0], [1], [0, 0, 1, 1], [], []>} : vector<16x4xf32>, vector<4x16xf32>, vector<16x16xf32> -> vector<16x16xf32>
    %42 = arith.addf %36, %41 : vector<16x16xf32>
    %c0_67 = arith.constant 0 : index
    %c2_68 = arith.constant 2 : index
    %c1_69 = arith.constant 1 : index
    %c0_70 = arith.constant 0 : index
    %c0_71 = arith.constant 0 : index
    %43 = vector.load %arg1[%c0_67, %c2_68, %c1_69, %c0_70, %c0_71] : memref<1x5x5x16x4xf32, #tpu.memory_space<vmem>>, vector<1x1x1x16x4xf32>
    %44 = vector.shape_cast %43 : vector<1x1x1x16x4xf32> to vector<16x4xf32>
    %c2_72 = arith.constant 2 : index
    %c1_73 = arith.constant 1 : index
    %c0_74 = arith.constant 0 : index
    %c0_75 = arith.constant 0 : index
    %45 = vector.load %arg2[%c2_72, %c1_73, %c0_74, %c0_75] : memref<3x3x4x16xf32, #tpu.memory_space<vmem>>, vector<1x1x4x16xf32>
    %46 = vector.shape_cast %45 : vector<1x1x4x16xf32> to vector<4x16xf32>
    %cst_76 = arith.constant dense<0.000000e+00> : vector<16x16xf32>
    %47 = tpu.matmul %44, %46, %cst_76 {dimension_numbers = #tpu.dot_dimension_numbers<[1], [0], [0], [1], [0, 0, 1, 1], [], []>} : vector<16x4xf32>, vector<4x16xf32>, vector<16x16xf32> -> vector<16x16xf32>
    %48 = arith.addf %42, %47 : vector<16x16xf32>
    %c0_77 = arith.constant 0 : index
    %c2_78 = arith.constant 2 : index
    %c2_79 = arith.constant 2 : index
    %c0_80 = arith.constant 0 : index
    %c0_81 = arith.constant 0 : index
    %49 = vector.load %arg1[%c0_77, %c2_78, %c2_79, %c0_80, %c0_81] : memref<1x5x5x16x4xf32, #tpu.memory_space<vmem>>, vector<1x1x1x16x4xf32>
    %50 = vector.shape_cast %49 : vector<1x1x1x16x4xf32> to vector<16x4xf32>
    %c2_82 = arith.constant 2 : index
    %c2_83 = arith.constant 2 : index
    %c0_84 = arith.constant 0 : index
    %c0_85 = arith.constant 0 : index
    %51 = vector.load %arg2[%c2_82, %c2_83, %c0_84, %c0_85] : memref<3x3x4x16xf32, #tpu.memory_space<vmem>>, vector<1x1x4x16xf32>
    %52 = vector.shape_cast %51 : vector<1x1x4x16xf32> to vector<4x16xf32>
    %cst_86 = arith.constant dense<0.000000e+00> : vector<16x16xf32>
    %53 = tpu.matmul %50, %52, %cst_86 {dimension_numbers = #tpu.dot_dimension_numbers<[1], [0], [0], [1], [0, 0, 1, 1], [], []>} : vector<16x4xf32>, vector<4x16xf32>, vector<16x16xf32> -> vector<16x16xf32>
    %54 = arith.addf %48, %53 : vector<16x16xf32>
    %c0_87 = arith.constant 0 : index
    %c0_88 = arith.constant 0 : index
    %55 = vector.load %arg3[%c0_87, %c0_88] : memref<1x16xf32, #tpu.memory_space<vmem>>, vector<1x16xf32>
    %56 = vector.broadcast %55 : vector<1x16xf32> to vector<16x16xf32>
    %57 = arith.addf %54, %56 : vector<16x16xf32>
    %cst_89 = arith.constant 0.000000e+00 : f32
    %58 = vector.broadcast %cst_89 : f32 to vector<16x16xf32>
    %59 = arith.maximumf %57, %58 : vector<16x16xf32>
    %cst_90 = arith.constant 0.000000e+00 : f32
    %60 = vector.broadcast %cst_90 : f32 to vector<16x16xf32>
    %c0_91 = arith.constant 0 : index
    %c0_92 = arith.constant 0 : index
    %c2_93 = arith.constant 2 : index
    %c0_94 = arith.constant 0 : index
    %c0_95 = arith.constant 0 : index
    %61 = vector.load %arg1[%c0_91, %c0_92, %c2_93, %c0_94, %c0_95] : memref<1x5x5x16x4xf32, #tpu.memory_space<vmem>>, vector<1x1x1x16x4xf32>
    %62 = vector.shape_cast %61 : vector<1x1x1x16x4xf32> to vector<16x4xf32>
    %c0_96 = arith.constant 0 : index
    %c0_97 = arith.constant 0 : index
    %c0_98 = arith.constant 0 : index
    %c0_99 = arith.constant 0 : index
    %63 = vector.load %arg2[%c0_96, %c0_97, %c0_98, %c0_99] : memref<3x3x4x16xf32, #tpu.memory_space<vmem>>, vector<1x1x4x16xf32>
    %64 = vector.shape_cast %63 : vector<1x1x4x16xf32> to vector<4x16xf32>
    %cst_100 = arith.constant dense<0.000000e+00> : vector<16x16xf32>
    %65 = tpu.matmul %62, %64, %cst_100 {dimension_numbers = #tpu.dot_dimension_numbers<[1], [0], [0], [1], [0, 0, 1, 1], [], []>} : vector<16x4xf32>, vector<4x16xf32>, vector<16x16xf32> -> vector<16x16xf32>
    %66 = arith.addf %60, %65 : vector<16x16xf32>
    %c0_101 = arith.constant 0 : index
    %c0_102 = arith.constant 0 : index
    %c3 = arith.constant 3 : index
    %c0_103 = arith.constant 0 : index
    %c0_104 = arith.constant 0 : index
    %67 = vector.load %arg1[%c0_101, %c0_102, %c3, %c0_103, %c0_104] : memref<1x5x5x16x4xf32, #tpu.memory_space<vmem>>, vector<1x1x1x16x4xf32>
    %68 = vector.shape_cast %67 : vector<1x1x1x16x4xf32> to vector<16x4xf32>
    %c0_105 = arith.constant 0 : index
    %c1_106 = arith.constant 1 : index
    %c0_107 = arith.constant 0 : index
    %c0_108 = arith.constant 0 : index
    %69 = vector.load %arg2[%c0_105, %c1_106, %c0_107, %c0_108] : memref<3x3x4x16xf32, #tpu.memory_space<vmem>>, vector<1x1x4x16xf32>
    %70 = vector.shape_cast %69 : vector<1x1x4x16xf32> to vector<4x16xf32>
    %cst_109 = arith.constant dense<0.000000e+00> : vector<16x16xf32>
    %71 = tpu.matmul %68, %70, %cst_109 {dimension_numbers = #tpu.dot_dimension_numbers<[1], [0], [0], [1], [0, 0, 1, 1], [], []>} : vector<16x4xf32>, vector<4x16xf32>, vector<16x16xf32> -> vector<16x16xf32>
    %72 = arith.addf %66, %71 : vector<16x16xf32>
    %c0_110 = arith.constant 0 : index
    %c0_111 = arith.constant 0 : index
    %c4 = arith.constant 4 : index
    %c0_112 = arith.constant 0 : index
    %c0_113 = arith.constant 0 : index
    %73 = vector.load %arg1[%c0_110, %c0_111, %c4, %c0_112, %c0_113] : memref<1x5x5x16x4xf32, #tpu.memory_space<vmem>>, vector<1x1x1x16x4xf32>
    %74 = vector.shape_cast %73 : vector<1x1x1x16x4xf32> to vector<16x4xf32>
    %c0_114 = arith.constant 0 : index
    %c2_115 = arith.constant 2 : index
    %c0_116 = arith.constant 0 : index
    %c0_117 = arith.constant 0 : index
    %75 = vector.load %arg2[%c0_114, %c2_115, %c0_116, %c0_117] : memref<3x3x4x16xf32, #tpu.memory_space<vmem>>, vector<1x1x4x16xf32>
    %76 = vector.shape_cast %75 : vector<1x1x4x16xf32> to vector<4x16xf32>
    %cst_118 = arith.constant dense<0.000000e+00> : vector<16x16xf32>
    %77 = tpu.matmul %74, %76, %cst_118 {dimension_numbers = #tpu.dot_dimension_numbers<[1], [0], [0], [1], [0, 0, 1, 1], [], []>} : vector<16x4xf32>, vector<4x16xf32>, vector<16x16xf32> -> vector<16x16xf32>
    %78 = arith.addf %72, %77 : vector<16x16xf32>
    %c0_119 = arith.constant 0 : index
    %c1_120 = arith.constant 1 : index
    %c2_121 = arith.constant 2 : index
    %c0_122 = arith.constant 0 : index
    %c0_123 = arith.constant 0 : index
    %79 = vector.load %arg1[%c0_119, %c1_120, %c2_121, %c0_122, %c0_123] : memref<1x5x5x16x4xf32, #tpu.memory_space<vmem>>, vector<1x1x1x16x4xf32>
    %80 = vector.shape_cast %79 : vector<1x1x1x16x4xf32> to vector<16x4xf32>
    %c1_124 = arith.constant 1 : index
    %c0_125 = arith.constant 0 : index
    %c0_126 = arith.constant 0 : index
    %c0_127 = arith.constant 0 : index
    %81 = vector.load %arg2[%c1_124, %c0_125, %c0_126, %c0_127] : memref<3x3x4x16xf32, #tpu.memory_space<vmem>>, vector<1x1x4x16xf32>
    %82 = vector.shape_cast %81 : vector<1x1x4x16xf32> to vector<4x16xf32>
    %cst_128 = arith.constant dense<0.000000e+00> : vector<16x16xf32>
    %83 = tpu.matmul %80, %82, %cst_128 {dimension_numbers = #tpu.dot_dimension_numbers<[1], [0], [0], [1], [0, 0, 1, 1], [], []>} : vector<16x4xf32>, vector<4x16xf32>, vector<16x16xf32> -> vector<16x16xf32>
    %84 = arith.addf %78, %83 : vector<16x16xf32>
    %c0_129 = arith.constant 0 : index
    %c1_130 = arith.constant 1 : index
    %c3_131 = arith.constant 3 : index
    %c0_132 = arith.constant 0 : index
    %c0_133 = arith.constant 0 : index
    %85 = vector.load %arg1[%c0_129, %c1_130, %c3_131, %c0_132, %c0_133] : memref<1x5x5x16x4xf32, #tpu.memory_space<vmem>>, vector<1x1x1x16x4xf32>
    %86 = vector.shape_cast %85 : vector<1x1x1x16x4xf32> to vector<16x4xf32>
    %c1_134 = arith.constant 1 : index
    %c1_135 = arith.constant 1 : index
    %c0_136 = arith.constant 0 : index
    %c0_137 = arith.constant 0 : index
    %87 = vector.load %arg2[%c1_134, %c1_135, %c0_136, %c0_137] : memref<3x3x4x16xf32, #tpu.memory_space<vmem>>, vector<1x1x4x16xf32>
    %88 = vector.shape_cast %87 : vector<1x1x4x16xf32> to vector<4x16xf32>
    %cst_138 = arith.constant dense<0.000000e+00> : vector<16x16xf32>
    %89 = tpu.matmul %86, %88, %cst_138 {dimension_numbers = #tpu.dot_dimension_numbers<[1], [0], [0], [1], [0, 0, 1, 1], [], []>} : vector<16x4xf32>, vector<4x16xf32>, vector<16x16xf32> -> vector<16x16xf32>
    %90 = arith.addf %84, %89 : vector<16x16xf32>
    %c0_139 = arith.constant 0 : index
    %c1_140 = arith.constant 1 : index
    %c4_141 = arith.constant 4 : index
    %c0_142 = arith.constant 0 : index
    %c0_143 = arith.constant 0 : index
    %91 = vector.load %arg1[%c0_139, %c1_140, %c4_141, %c0_142, %c0_143] : memref<1x5x5x16x4xf32, #tpu.memory_space<vmem>>, vector<1x1x1x16x4xf32>
    %92 = vector.shape_cast %91 : vector<1x1x1x16x4xf32> to vector<16x4xf32>
    %c1_144 = arith.constant 1 : index
    %c2_145 = arith.constant 2 : index
    %c0_146 = arith.constant 0 : index
    %c0_147 = arith.constant 0 : index
    %93 = vector.load %arg2[%c1_144, %c2_145, %c0_146, %c0_147] : memref<3x3x4x16xf32, #tpu.memory_space<vmem>>, vector<1x1x4x16xf32>
    %94 = vector.shape_cast %93 : vector<1x1x4x16xf32> to vector<4x16xf32>
    %cst_148 = arith.constant dense<0.000000e+00> : vector<16x16xf32>
    %95 = tpu.matmul %92, %94, %cst_148 {dimension_numbers = #tpu.dot_dimension_numbers<[1], [0], [0], [1], [0, 0, 1, 1], [], []>} : vector<16x4xf32>, vector<4x16xf32>, vector<16x16xf32> -> vector<16x16xf32>
    %96 = arith.addf %90, %95 : vector<16x16xf32>
    %c0_149 = arith.constant 0 : index
    %c2_150 = arith.constant 2 : index
    %c2_151 = arith.constant 2 : index
    %c0_152 = arith.constant 0 : index
    %c0_153 = arith.constant 0 : index
    %97 = vector.load %arg1[%c0_149, %c2_150, %c2_151, %c0_152, %c0_153] : memref<1x5x5x16x4xf32, #tpu.memory_space<vmem>>, vector<1x1x1x16x4xf32>
    %98 = vector.shape_cast %97 : vector<1x1x1x16x4xf32> to vector<16x4xf32>
    %c2_154 = arith.constant 2 : index
    %c0_155 = arith.constant 0 : index
    %c0_156 = arith.constant 0 : index
    %c0_157 = arith.constant 0 : index
    %99 = vector.load %arg2[%c2_154, %c0_155, %c0_156, %c0_157] : memref<3x3x4x16xf32, #tpu.memory_space<vmem>>, vector<1x1x4x16xf32>
    %100 = vector.shape_cast %99 : vector<1x1x4x16xf32> to vector<4x16xf32>
    %cst_158 = arith.constant dense<0.000000e+00> : vector<16x16xf32>
    %101 = tpu.matmul %98, %100, %cst_158 {dimension_numbers = #tpu.dot_dimension_numbers<[1], [0], [0], [1], [0, 0, 1, 1], [], []>} : vector<16x4xf32>, vector<4x16xf32>, vector<16x16xf32> -> vector<16x16xf32>
    %102 = arith.addf %96, %101 : vector<16x16xf32>
    %c0_159 = arith.constant 0 : index
    %c2_160 = arith.constant 2 : index
    %c3_161 = arith.constant 3 : index
    %c0_162 = arith.constant 0 : index
    %c0_163 = arith.constant 0 : index
    %103 = vector.load %arg1[%c0_159, %c2_160, %c3_161, %c0_162, %c0_163] : memref<1x5x5x16x4xf32, #tpu.memory_space<vmem>>, vector<1x1x1x16x4xf32>
    %104 = vector.shape_cast %103 : vector<1x1x1x16x4xf32> to vector<16x4xf32>
    %c2_164 = arith.constant 2 : index
    %c1_165 = arith.constant 1 : index
    %c0_166 = arith.constant 0 : index
    %c0_167 = arith.constant 0 : index
    %105 = vector.load %arg2[%c2_164, %c1_165, %c0_166, %c0_167] : memref<3x3x4x16xf32, #tpu.memory_space<vmem>>, vector<1x1x4x16xf32>
    %106 = vector.shape_cast %105 : vector<1x1x4x16xf32> to vector<4x16xf32>
    %cst_168 = arith.constant dense<0.000000e+00> : vector<16x16xf32>
    %107 = tpu.matmul %104, %106, %cst_168 {dimension_numbers = #tpu.dot_dimension_numbers<[1], [0], [0], [1], [0, 0, 1, 1], [], []>} : vector<16x4xf32>, vector<4x16xf32>, vector<16x16xf32> -> vector<16x16xf32>
    %108 = arith.addf %102, %107 : vector<16x16xf32>
    %c0_169 = arith.constant 0 : index
    %c2_170 = arith.constant 2 : index
    %c4_171 = arith.constant 4 : index
    %c0_172 = arith.constant 0 : index
    %c0_173 = arith.constant 0 : index
    %109 = vector.load %arg1[%c0_169, %c2_170, %c4_171, %c0_172, %c0_173] : memref<1x5x5x16x4xf32, #tpu.memory_space<vmem>>, vector<1x1x1x16x4xf32>
    %110 = vector.shape_cast %109 : vector<1x1x1x16x4xf32> to vector<16x4xf32>
    %c2_174 = arith.constant 2 : index
    %c2_175 = arith.constant 2 : index
    %c0_176 = arith.constant 0 : index
    %c0_177 = arith.constant 0 : index
    %111 = vector.load %arg2[%c2_174, %c2_175, %c0_176, %c0_177] : memref<3x3x4x16xf32, #tpu.memory_space<vmem>>, vector<1x1x4x16xf32>
    %112 = vector.shape_cast %111 : vector<1x1x4x16xf32> to vector<4x16xf32>
    %cst_178 = arith.constant dense<0.000000e+00> : vector<16x16xf32>
    %113 = tpu.matmul %110, %112, %cst_178 {dimension_numbers = #tpu.dot_dimension_numbers<[1], [0], [0], [1], [0, 0, 1, 1], [], []>} : vector<16x4xf32>, vector<4x16xf32>, vector<16x16xf32> -> vector<16x16xf32>
    %114 = arith.addf %108, %113 : vector<16x16xf32>
    %c0_179 = arith.constant 0 : index
    %c0_180 = arith.constant 0 : index
    %115 = vector.load %arg3[%c0_179, %c0_180] : memref<1x16xf32, #tpu.memory_space<vmem>>, vector<1x16xf32>
    %116 = vector.broadcast %115 : vector<1x16xf32> to vector<16x16xf32>
    %117 = arith.addf %114, %116 : vector<16x16xf32>
    %cst_181 = arith.constant 0.000000e+00 : f32
    %118 = vector.broadcast %cst_181 : f32 to vector<16x16xf32>
    %119 = arith.maximumf %117, %118 : vector<16x16xf32>
    %cst_182 = arith.constant 0.000000e+00 : f32
    %120 = vector.broadcast %cst_182 : f32 to vector<16x16xf32>
    %c0_183 = arith.constant 0 : index
    %c2_184 = arith.constant 2 : index
    %c0_185 = arith.constant 0 : index
    %c0_186 = arith.constant 0 : index
    %c0_187 = arith.constant 0 : index
    %121 = vector.load %arg1[%c0_183, %c2_184, %c0_185, %c0_186, %c0_187] : memref<1x5x5x16x4xf32, #tpu.memory_space<vmem>>, vector<1x1x1x16x4xf32>
    %122 = vector.shape_cast %121 : vector<1x1x1x16x4xf32> to vector<16x4xf32>
    %c0_188 = arith.constant 0 : index
    %c0_189 = arith.constant 0 : index
    %c0_190 = arith.constant 0 : index
    %c0_191 = arith.constant 0 : index
    %123 = vector.load %arg2[%c0_188, %c0_189, %c0_190, %c0_191] : memref<3x3x4x16xf32, #tpu.memory_space<vmem>>, vector<1x1x4x16xf32>
    %124 = vector.shape_cast %123 : vector<1x1x4x16xf32> to vector<4x16xf32>
    %cst_192 = arith.constant dense<0.000000e+00> : vector<16x16xf32>
    %125 = tpu.matmul %122, %124, %cst_192 {dimension_numbers = #tpu.dot_dimension_numbers<[1], [0], [0], [1], [0, 0, 1, 1], [], []>} : vector<16x4xf32>, vector<4x16xf32>, vector<16x16xf32> -> vector<16x16xf32>
    %126 = arith.addf %120, %125 : vector<16x16xf32>
    %c0_193 = arith.constant 0 : index
    %c2_194 = arith.constant 2 : index
    %c1_195 = arith.constant 1 : index
    %c0_196 = arith.constant 0 : index
    %c0_197 = arith.constant 0 : index
    %127 = vector.load %arg1[%c0_193, %c2_194, %c1_195, %c0_196, %c0_197] : memref<1x5x5x16x4xf32, #tpu.memory_space<vmem>>, vector<1x1x1x16x4xf32>
    %128 = vector.shape_cast %127 : vector<1x1x1x16x4xf32> to vector<16x4xf32>
    %c0_198 = arith.constant 0 : index
    %c1_199 = arith.constant 1 : index
    %c0_200 = arith.constant 0 : index
    %c0_201 = arith.constant 0 : index
    %129 = vector.load %arg2[%c0_198, %c1_199, %c0_200, %c0_201] : memref<3x3x4x16xf32, #tpu.memory_space<vmem>>, vector<1x1x4x16xf32>
    %130 = vector.shape_cast %129 : vector<1x1x4x16xf32> to vector<4x16xf32>
    %cst_202 = arith.constant dense<0.000000e+00> : vector<16x16xf32>
    %131 = tpu.matmul %128, %130, %cst_202 {dimension_numbers = #tpu.dot_dimension_numbers<[1], [0], [0], [1], [0, 0, 1, 1], [], []>} : vector<16x4xf32>, vector<4x16xf32>, vector<16x16xf32> -> vector<16x16xf32>
    %132 = arith.addf %126, %131 : vector<16x16xf32>
    %c0_203 = arith.constant 0 : index
    %c2_204 = arith.constant 2 : index
    %c2_205 = arith.constant 2 : index
    %c0_206 = arith.constant 0 : index
    %c0_207 = arith.constant 0 : index
    %133 = vector.load %arg1[%c0_203, %c2_204, %c2_205, %c0_206, %c0_207] : memref<1x5x5x16x4xf32, #tpu.memory_space<vmem>>, vector<1x1x1x16x4xf32>
    %134 = vector.shape_cast %133 : vector<1x1x1x16x4xf32> to vector<16x4xf32>
    %c0_208 = arith.constant 0 : index
    %c2_209 = arith.constant 2 : index
    %c0_210 = arith.constant 0 : index
    %c0_211 = arith.constant 0 : index
    %135 = vector.load %arg2[%c0_208, %c2_209, %c0_210, %c0_211] : memref<3x3x4x16xf32, #tpu.memory_space<vmem>>, vector<1x1x4x16xf32>
    %136 = vector.shape_cast %135 : vector<1x1x4x16xf32> to vector<4x16xf32>
    %cst_212 = arith.constant dense<0.000000e+00> : vector<16x16xf32>
    %137 = tpu.matmul %134, %136, %cst_212 {dimension_numbers = #tpu.dot_dimension_numbers<[1], [0], [0], [1], [0, 0, 1, 1], [], []>} : vector<16x4xf32>, vector<4x16xf32>, vector<16x16xf32> -> vector<16x16xf32>
    %138 = arith.addf %132, %137 : vector<16x16xf32>
    %c0_213 = arith.constant 0 : index
    %c3_214 = arith.constant 3 : index
    %c0_215 = arith.constant 0 : index
    %c0_216 = arith.constant 0 : index
    %c0_217 = arith.constant 0 : index
    %139 = vector.load %arg1[%c0_213, %c3_214, %c0_215, %c0_216, %c0_217] : memref<1x5x5x16x4xf32, #tpu.memory_space<vmem>>, vector<1x1x1x16x4xf32>
    %140 = vector.shape_cast %139 : vector<1x1x1x16x4xf32> to vector<16x4xf32>
    %c1_218 = arith.constant 1 : index
    %c0_219 = arith.constant 0 : index
    %c0_220 = arith.constant 0 : index
    %c0_221 = arith.constant 0 : index
    %141 = vector.load %arg2[%c1_218, %c0_219, %c0_220, %c0_221] : memref<3x3x4x16xf32, #tpu.memory_space<vmem>>, vector<1x1x4x16xf32>
    %142 = vector.shape_cast %141 : vector<1x1x4x16xf32> to vector<4x16xf32>
    %cst_222 = arith.constant dense<0.000000e+00> : vector<16x16xf32>
    %143 = tpu.matmul %140, %142, %cst_222 {dimension_numbers = #tpu.dot_dimension_numbers<[1], [0], [0], [1], [0, 0, 1, 1], [], []>} : vector<16x4xf32>, vector<4x16xf32>, vector<16x16xf32> -> vector<16x16xf32>
    %144 = arith.addf %138, %143 : vector<16x16xf32>
    %c0_223 = arith.constant 0 : index
    %c3_224 = arith.constant 3 : index
    %c1_225 = arith.constant 1 : index
    %c0_226 = arith.constant 0 : index
    %c0_227 = arith.constant 0 : index
    %145 = vector.load %arg1[%c0_223, %c3_224, %c1_225, %c0_226, %c0_227] : memref<1x5x5x16x4xf32, #tpu.memory_space<vmem>>, vector<1x1x1x16x4xf32>
    %146 = vector.shape_cast %145 : vector<1x1x1x16x4xf32> to vector<16x4xf32>
    %c1_228 = arith.constant 1 : index
    %c1_229 = arith.constant 1 : index
    %c0_230 = arith.constant 0 : index
    %c0_231 = arith.constant 0 : index
    %147 = vector.load %arg2[%c1_228, %c1_229, %c0_230, %c0_231] : memref<3x3x4x16xf32, #tpu.memory_space<vmem>>, vector<1x1x4x16xf32>
    %148 = vector.shape_cast %147 : vector<1x1x4x16xf32> to vector<4x16xf32>
    %cst_232 = arith.constant dense<0.000000e+00> : vector<16x16xf32>
    %149 = tpu.matmul %146, %148, %cst_232 {dimension_numbers = #tpu.dot_dimension_numbers<[1], [0], [0], [1], [0, 0, 1, 1], [], []>} : vector<16x4xf32>, vector<4x16xf32>, vector<16x16xf32> -> vector<16x16xf32>
    %150 = arith.addf %144, %149 : vector<16x16xf32>
    %c0_233 = arith.constant 0 : index
    %c3_234 = arith.constant 3 : index
    %c2_235 = arith.constant 2 : index
    %c0_236 = arith.constant 0 : index
    %c0_237 = arith.constant 0 : index
    %151 = vector.load %arg1[%c0_233, %c3_234, %c2_235, %c0_236, %c0_237] : memref<1x5x5x16x4xf32, #tpu.memory_space<vmem>>, vector<1x1x1x16x4xf32>
    %152 = vector.shape_cast %151 : vector<1x1x1x16x4xf32> to vector<16x4xf32>
    %c1_238 = arith.constant 1 : index
    %c2_239 = arith.constant 2 : index
    %c0_240 = arith.constant 0 : index
    %c0_241 = arith.constant 0 : index
    %153 = vector.load %arg2[%c1_238, %c2_239, %c0_240, %c0_241] : memref<3x3x4x16xf32, #tpu.memory_space<vmem>>, vector<1x1x4x16xf32>
    %154 = vector.shape_cast %153 : vector<1x1x4x16xf32> to vector<4x16xf32>
    %cst_242 = arith.constant dense<0.000000e+00> : vector<16x16xf32>
    %155 = tpu.matmul %152, %154, %cst_242 {dimension_numbers = #tpu.dot_dimension_numbers<[1], [0], [0], [1], [0, 0, 1, 1], [], []>} : vector<16x4xf32>, vector<4x16xf32>, vector<16x16xf32> -> vector<16x16xf32>
    %156 = arith.addf %150, %155 : vector<16x16xf32>
    %c0_243 = arith.constant 0 : index
    %c4_244 = arith.constant 4 : index
    %c0_245 = arith.constant 0 : index
    %c0_246 = arith.constant 0 : index
    %c0_247 = arith.constant 0 : index
    %157 = vector.load %arg1[%c0_243, %c4_244, %c0_245, %c0_246, %c0_247] : memref<1x5x5x16x4xf32, #tpu.memory_space<vmem>>, vector<1x1x1x16x4xf32>
    %158 = vector.shape_cast %157 : vector<1x1x1x16x4xf32> to vector<16x4xf32>
    %c2_248 = arith.constant 2 : index
    %c0_249 = arith.constant 0 : index
    %c0_250 = arith.constant 0 : index
    %c0_251 = arith.constant 0 : index
    %159 = vector.load %arg2[%c2_248, %c0_249, %c0_250, %c0_251] : memref<3x3x4x16xf32, #tpu.memory_space<vmem>>, vector<1x1x4x16xf32>
    %160 = vector.shape_cast %159 : vector<1x1x4x16xf32> to vector<4x16xf32>
    %cst_252 = arith.constant dense<0.000000e+00> : vector<16x16xf32>
    %161 = tpu.matmul %158, %160, %cst_252 {dimension_numbers = #tpu.dot_dimension_numbers<[1], [0], [0], [1], [0, 0, 1, 1], [], []>} : vector<16x4xf32>, vector<4x16xf32>, vector<16x16xf32> -> vector<16x16xf32>
    %162 = arith.addf %156, %161 : vector<16x16xf32>
    %c0_253 = arith.constant 0 : index
    %c4_254 = arith.constant 4 : index
    %c1_255 = arith.constant 1 : index
    %c0_256 = arith.constant 0 : index
    %c0_257 = arith.constant 0 : index
    %163 = vector.load %arg1[%c0_253, %c4_254, %c1_255, %c0_256, %c0_257] : memref<1x5x5x16x4xf32, #tpu.memory_space<vmem>>, vector<1x1x1x16x4xf32>
    %164 = vector.shape_cast %163 : vector<1x1x1x16x4xf32> to vector<16x4xf32>
    %c2_258 = arith.constant 2 : index
    %c1_259 = arith.constant 1 : index
    %c0_260 = arith.constant 0 : index
    %c0_261 = arith.constant 0 : index
    %165 = vector.load %arg2[%c2_258, %c1_259, %c0_260, %c0_261] : memref<3x3x4x16xf32, #tpu.memory_space<vmem>>, vector<1x1x4x16xf32>
    %166 = vector.shape_cast %165 : vector<1x1x4x16xf32> to vector<4x16xf32>
    %cst_262 = arith.constant dense<0.000000e+00> : vector<16x16xf32>
    %167 = tpu.matmul %164, %166, %cst_262 {dimension_numbers = #tpu.dot_dimension_numbers<[1], [0], [0], [1], [0, 0, 1, 1], [], []>} : vector<16x4xf32>, vector<4x16xf32>, vector<16x16xf32> -> vector<16x16xf32>
    %168 = arith.addf %162, %167 : vector<16x16xf32>
    %c0_263 = arith.constant 0 : index
    %c4_264 = arith.constant 4 : index
    %c2_265 = arith.constant 2 : index
    %c0_266 = arith.constant 0 : index
    %c0_267 = arith.constant 0 : index
    %169 = vector.load %arg1[%c0_263, %c4_264, %c2_265, %c0_266, %c0_267] : memref<1x5x5x16x4xf32, #tpu.memory_space<vmem>>, vector<1x1x1x16x4xf32>
    %170 = vector.shape_cast %169 : vector<1x1x1x16x4xf32> to vector<16x4xf32>
    %c2_268 = arith.constant 2 : index
    %c2_269 = arith.constant 2 : index
    %c0_270 = arith.constant 0 : index
    %c0_271 = arith.constant 0 : index
    %171 = vector.load %arg2[%c2_268, %c2_269, %c0_270, %c0_271] : memref<3x3x4x16xf32, #tpu.memory_space<vmem>>, vector<1x1x4x16xf32>
    %172 = vector.shape_cast %171 : vector<1x1x4x16xf32> to vector<4x16xf32>
    %cst_272 = arith.constant dense<0.000000e+00> : vector<16x16xf32>
    %173 = tpu.matmul %170, %172, %cst_272 {dimension_numbers = #tpu.dot_dimension_numbers<[1], [0], [0], [1], [0, 0, 1, 1], [], []>} : vector<16x4xf32>, vector<4x16xf32>, vector<16x16xf32> -> vector<16x16xf32>
    %174 = arith.addf %168, %173 : vector<16x16xf32>
    %c0_273 = arith.constant 0 : index
    %c0_274 = arith.constant 0 : index
    %175 = vector.load %arg3[%c0_273, %c0_274] : memref<1x16xf32, #tpu.memory_space<vmem>>, vector<1x16xf32>
    %176 = vector.broadcast %175 : vector<1x16xf32> to vector<16x16xf32>
    %177 = arith.addf %174, %176 : vector<16x16xf32>
    %cst_275 = arith.constant 0.000000e+00 : f32
    %178 = vector.broadcast %cst_275 : f32 to vector<16x16xf32>
    %179 = arith.maximumf %177, %178 : vector<16x16xf32>
    %cst_276 = arith.constant 0.000000e+00 : f32
    %180 = vector.broadcast %cst_276 : f32 to vector<16x16xf32>
    %c0_277 = arith.constant 0 : index
    %c2_278 = arith.constant 2 : index
    %c2_279 = arith.constant 2 : index
    %c0_280 = arith.constant 0 : index
    %c0_281 = arith.constant 0 : index
    %181 = vector.load %arg1[%c0_277, %c2_278, %c2_279, %c0_280, %c0_281] : memref<1x5x5x16x4xf32, #tpu.memory_space<vmem>>, vector<1x1x1x16x4xf32>
    %182 = vector.shape_cast %181 : vector<1x1x1x16x4xf32> to vector<16x4xf32>
    %c0_282 = arith.constant 0 : index
    %c0_283 = arith.constant 0 : index
    %c0_284 = arith.constant 0 : index
    %c0_285 = arith.constant 0 : index
    %183 = vector.load %arg2[%c0_282, %c0_283, %c0_284, %c0_285] : memref<3x3x4x16xf32, #tpu.memory_space<vmem>>, vector<1x1x4x16xf32>
    %184 = vector.shape_cast %183 : vector<1x1x4x16xf32> to vector<4x16xf32>
    %cst_286 = arith.constant dense<0.000000e+00> : vector<16x16xf32>
    %185 = tpu.matmul %182, %184, %cst_286 {dimension_numbers = #tpu.dot_dimension_numbers<[1], [0], [0], [1], [0, 0, 1, 1], [], []>} : vector<16x4xf32>, vector<4x16xf32>, vector<16x16xf32> -> vector<16x16xf32>
    %186 = arith.addf %180, %185 : vector<16x16xf32>
    %c0_287 = arith.constant 0 : index
    %c2_288 = arith.constant 2 : index
    %c3_289 = arith.constant 3 : index
    %c0_290 = arith.constant 0 : index
    %c0_291 = arith.constant 0 : index
    %187 = vector.load %arg1[%c0_287, %c2_288, %c3_289, %c0_290, %c0_291] : memref<1x5x5x16x4xf32, #tpu.memory_space<vmem>>, vector<1x1x1x16x4xf32>
    %188 = vector.shape_cast %187 : vector<1x1x1x16x4xf32> to vector<16x4xf32>
    %c0_292 = arith.constant 0 : index
    %c1_293 = arith.constant 1 : index
    %c0_294 = arith.constant 0 : index
    %c0_295 = arith.constant 0 : index
    %189 = vector.load %arg2[%c0_292, %c1_293, %c0_294, %c0_295] : memref<3x3x4x16xf32, #tpu.memory_space<vmem>>, vector<1x1x4x16xf32>
    %190 = vector.shape_cast %189 : vector<1x1x4x16xf32> to vector<4x16xf32>
    %cst_296 = arith.constant dense<0.000000e+00> : vector<16x16xf32>
    %191 = tpu.matmul %188, %190, %cst_296 {dimension_numbers = #tpu.dot_dimension_numbers<[1], [0], [0], [1], [0, 0, 1, 1], [], []>} : vector<16x4xf32>, vector<4x16xf32>, vector<16x16xf32> -> vector<16x16xf32>
    %192 = arith.addf %186, %191 : vector<16x16xf32>
    %c0_297 = arith.constant 0 : index
    %c2_298 = arith.constant 2 : index
    %c4_299 = arith.constant 4 : index
    %c0_300 = arith.constant 0 : index
    %c0_301 = arith.constant 0 : index
    %193 = vector.load %arg1[%c0_297, %c2_298, %c4_299, %c0_300, %c0_301] : memref<1x5x5x16x4xf32, #tpu.memory_space<vmem>>, vector<1x1x1x16x4xf32>
    %194 = vector.shape_cast %193 : vector<1x1x1x16x4xf32> to vector<16x4xf32>
    %c0_302 = arith.constant 0 : index
    %c2_303 = arith.constant 2 : index
    %c0_304 = arith.constant 0 : index
    %c0_305 = arith.constant 0 : index
    %195 = vector.load %arg2[%c0_302, %c2_303, %c0_304, %c0_305] : memref<3x3x4x16xf32, #tpu.memory_space<vmem>>, vector<1x1x4x16xf32>
    %196 = vector.shape_cast %195 : vector<1x1x4x16xf32> to vector<4x16xf32>
    %cst_306 = arith.constant dense<0.000000e+00> : vector<16x16xf32>
    %197 = tpu.matmul %194, %196, %cst_306 {dimension_numbers = #tpu.dot_dimension_numbers<[1], [0], [0], [1], [0, 0, 1, 1], [], []>} : vector<16x4xf32>, vector<4x16xf32>, vector<16x16xf32> -> vector<16x16xf32>
    %198 = arith.addf %192, %197 : vector<16x16xf32>
    %c0_307 = arith.constant 0 : index
    %c3_308 = arith.constant 3 : index
    %c2_309 = arith.constant 2 : index
    %c0_310 = arith.constant 0 : index
    %c0_311 = arith.constant 0 : index
    %199 = vector.load %arg1[%c0_307, %c3_308, %c2_309, %c0_310, %c0_311] : memref<1x5x5x16x4xf32, #tpu.memory_space<vmem>>, vector<1x1x1x16x4xf32>
    %200 = vector.shape_cast %199 : vector<1x1x1x16x4xf32> to vector<16x4xf32>
    %c1_312 = arith.constant 1 : index
    %c0_313 = arith.constant 0 : index
    %c0_314 = arith.constant 0 : index
    %c0_315 = arith.constant 0 : index
    %201 = vector.load %arg2[%c1_312, %c0_313, %c0_314, %c0_315] : memref<3x3x4x16xf32, #tpu.memory_space<vmem>>, vector<1x1x4x16xf32>
    %202 = vector.shape_cast %201 : vector<1x1x4x16xf32> to vector<4x16xf32>
    %cst_316 = arith.constant dense<0.000000e+00> : vector<16x16xf32>
    %203 = tpu.matmul %200, %202, %cst_316 {dimension_numbers = #tpu.dot_dimension_numbers<[1], [0], [0], [1], [0, 0, 1, 1], [], []>} : vector<16x4xf32>, vector<4x16xf32>, vector<16x16xf32> -> vector<16x16xf32>
    %204 = arith.addf %198, %203 : vector<16x16xf32>
    %c0_317 = arith.constant 0 : index
    %c3_318 = arith.constant 3 : index
    %c3_319 = arith.constant 3 : index
    %c0_320 = arith.constant 0 : index
    %c0_321 = arith.constant 0 : index
    %205 = vector.load %arg1[%c0_317, %c3_318, %c3_319, %c0_320, %c0_321] : memref<1x5x5x16x4xf32, #tpu.memory_space<vmem>>, vector<1x1x1x16x4xf32>
    %206 = vector.shape_cast %205 : vector<1x1x1x16x4xf32> to vector<16x4xf32>
    %c1_322 = arith.constant 1 : index
    %c1_323 = arith.constant 1 : index
    %c0_324 = arith.constant 0 : index
    %c0_325 = arith.constant 0 : index
    %207 = vector.load %arg2[%c1_322, %c1_323, %c0_324, %c0_325] : memref<3x3x4x16xf32, #tpu.memory_space<vmem>>, vector<1x1x4x16xf32>
    %208 = vector.shape_cast %207 : vector<1x1x4x16xf32> to vector<4x16xf32>
    %cst_326 = arith.constant dense<0.000000e+00> : vector<16x16xf32>
    %209 = tpu.matmul %206, %208, %cst_326 {dimension_numbers = #tpu.dot_dimension_numbers<[1], [0], [0], [1], [0, 0, 1, 1], [], []>} : vector<16x4xf32>, vector<4x16xf32>, vector<16x16xf32> -> vector<16x16xf32>
    %210 = arith.addf %204, %209 : vector<16x16xf32>
    %c0_327 = arith.constant 0 : index
    %c3_328 = arith.constant 3 : index
    %c4_329 = arith.constant 4 : index
    %c0_330 = arith.constant 0 : index
    %c0_331 = arith.constant 0 : index
    %211 = vector.load %arg1[%c0_327, %c3_328, %c4_329, %c0_330, %c0_331] : memref<1x5x5x16x4xf32, #tpu.memory_space<vmem>>, vector<1x1x1x16x4xf32>
    %212 = vector.shape_cast %211 : vector<1x1x1x16x4xf32> to vector<16x4xf32>
    %c1_332 = arith.constant 1 : index
    %c2_333 = arith.constant 2 : index
    %c0_334 = arith.constant 0 : index
    %c0_335 = arith.constant 0 : index
    %213 = vector.load %arg2[%c1_332, %c2_333, %c0_334, %c0_335] : memref<3x3x4x16xf32, #tpu.memory_space<vmem>>, vector<1x1x4x16xf32>
    %214 = vector.shape_cast %213 : vector<1x1x4x16xf32> to vector<4x16xf32>
    %cst_336 = arith.constant dense<0.000000e+00> : vector<16x16xf32>
    %215 = tpu.matmul %212, %214, %cst_336 {dimension_numbers = #tpu.dot_dimension_numbers<[1], [0], [0], [1], [0, 0, 1, 1], [], []>} : vector<16x4xf32>, vector<4x16xf32>, vector<16x16xf32> -> vector<16x16xf32>
    %216 = arith.addf %210, %215 : vector<16x16xf32>
    %c0_337 = arith.constant 0 : index
    %c4_338 = arith.constant 4 : index
    %c2_339 = arith.constant 2 : index
    %c0_340 = arith.constant 0 : index
    %c0_341 = arith.constant 0 : index
    %217 = vector.load %arg1[%c0_337, %c4_338, %c2_339, %c0_340, %c0_341] : memref<1x5x5x16x4xf32, #tpu.memory_space<vmem>>, vector<1x1x1x16x4xf32>
    %218 = vector.shape_cast %217 : vector<1x1x1x16x4xf32> to vector<16x4xf32>
    %c2_342 = arith.constant 2 : index
    %c0_343 = arith.constant 0 : index
    %c0_344 = arith.constant 0 : index
    %c0_345 = arith.constant 0 : index
    %219 = vector.load %arg2[%c2_342, %c0_343, %c0_344, %c0_345] : memref<3x3x4x16xf32, #tpu.memory_space<vmem>>, vector<1x1x4x16xf32>
    %220 = vector.shape_cast %219 : vector<1x1x4x16xf32> to vector<4x16xf32>
    %cst_346 = arith.constant dense<0.000000e+00> : vector<16x16xf32>
    %221 = tpu.matmul %218, %220, %cst_346 {dimension_numbers = #tpu.dot_dimension_numbers<[1], [0], [0], [1], [0, 0, 1, 1], [], []>} : vector<16x4xf32>, vector<4x16xf32>, vector<16x16xf32> -> vector<16x16xf32>
    %222 = arith.addf %216, %221 : vector<16x16xf32>
    %c0_347 = arith.constant 0 : index
    %c4_348 = arith.constant 4 : index
    %c3_349 = arith.constant 3 : index
    %c0_350 = arith.constant 0 : index
    %c0_351 = arith.constant 0 : index
    %223 = vector.load %arg1[%c0_347, %c4_348, %c3_349, %c0_350, %c0_351] : memref<1x5x5x16x4xf32, #tpu.memory_space<vmem>>, vector<1x1x1x16x4xf32>
    %224 = vector.shape_cast %223 : vector<1x1x1x16x4xf32> to vector<16x4xf32>
    %c2_352 = arith.constant 2 : index
    %c1_353 = arith.constant 1 : index
    %c0_354 = arith.constant 0 : index
    %c0_355 = arith.constant 0 : index
    %225 = vector.load %arg2[%c2_352, %c1_353, %c0_354, %c0_355] : memref<3x3x4x16xf32, #tpu.memory_space<vmem>>, vector<1x1x4x16xf32>
    %226 = vector.shape_cast %225 : vector<1x1x4x16xf32> to vector<4x16xf32>
    %cst_356 = arith.constant dense<0.000000e+00> : vector<16x16xf32>
    %227 = tpu.matmul %224, %226, %cst_356 {dimension_numbers = #tpu.dot_dimension_numbers<[1], [0], [0], [1], [0, 0, 1, 1], [], []>} : vector<16x4xf32>, vector<4x16xf32>, vector<16x16xf32> -> vector<16x16xf32>
    %228 = arith.addf %222, %227 : vector<16x16xf32>
    %c0_357 = arith.constant 0 : index
    %c4_358 = arith.constant 4 : index
    %c4_359 = arith.constant 4 : index
    %c0_360 = arith.constant 0 : index
    %c0_361 = arith.constant 0 : index
    %229 = vector.load %arg1[%c0_357, %c4_358, %c4_359, %c0_360, %c0_361] : memref<1x5x5x16x4xf32, #tpu.memory_space<vmem>>, vector<1x1x1x16x4xf32>
    %230 = vector.shape_cast %229 : vector<1x1x1x16x4xf32> to vector<16x4xf32>
    %c2_362 = arith.constant 2 : index
    %c2_363 = arith.constant 2 : index
    %c0_364 = arith.constant 0 : index
    %c0_365 = arith.constant 0 : index
    %231 = vector.load %arg2[%c2_362, %c2_363, %c0_364, %c0_365] : memref<3x3x4x16xf32, #tpu.memory_space<vmem>>, vector<1x1x4x16xf32>
    %232 = vector.shape_cast %231 : vector<1x1x4x16xf32> to vector<4x16xf32>
    %cst_366 = arith.constant dense<0.000000e+00> : vector<16x16xf32>
    %233 = tpu.matmul %230, %232, %cst_366 {dimension_numbers = #tpu.dot_dimension_numbers<[1], [0], [0], [1], [0, 0, 1, 1], [], []>} : vector<16x4xf32>, vector<4x16xf32>, vector<16x16xf32> -> vector<16x16xf32>
    %234 = arith.addf %228, %233 : vector<16x16xf32>
    %c0_367 = arith.constant 0 : index
    %c0_368 = arith.constant 0 : index
    %235 = vector.load %arg3[%c0_367, %c0_368] : memref<1x16xf32, #tpu.memory_space<vmem>>, vector<1x16xf32>
    %236 = vector.broadcast %235 : vector<1x16xf32> to vector<16x16xf32>
    %237 = arith.addf %234, %236 : vector<16x16xf32>
    %cst_369 = arith.constant 0.000000e+00 : f32
    %238 = vector.broadcast %cst_369 : f32 to vector<16x16xf32>
    %239 = arith.maximumf %237, %238 : vector<16x16xf32>
    %cst_370 = arith.constant 0.000000e+00 : f32
    %240 = vector.broadcast %cst_370 : f32 to vector<16x32xf32>
    %c0_371 = arith.constant 0 : index
    %c0_372 = arith.constant 0 : index
    %c0_373 = arith.constant 0 : index
    %c0_374 = arith.constant 0 : index
    %241 = vector.load %arg6[%c0_371, %c0_372, %c0_373, %c0_374] : memref<3x3x16x16xf32, #tpu.memory_space<vmem>>, vector<1x1x16x16xf32>
    %242 = vector.shape_cast %241 : vector<1x1x16x16xf32> to vector<16x16xf32>
    %cst_375 = arith.constant dense<0.000000e+00> : vector<16x16xf32>
    %243 = tpu.matmul %242, %239, %cst_375 {dimension_numbers = #tpu.dot_dimension_numbers<[1], [0], [0], [1], [0, 0, 1, 1], [], []>} : vector<16x16xf32>, vector<16x16xf32>, vector<16x16xf32> -> vector<16x16xf32>
    %c0_376 = arith.constant 0 : index
    %c0_377 = arith.constant 0 : index
    %c0_378 = arith.constant 0 : index
    %c0_379 = arith.constant 0 : index
    %244 = vector.load %arg4[%c0_376, %c0_377, %c0_378, %c0_379] : memref<3x3x16x32xf32, #tpu.memory_space<vmem>>, vector<1x1x16x32xf32>
    %245 = vector.shape_cast %244 : vector<1x1x16x32xf32> to vector<16x32xf32>
    %cst_380 = arith.constant dense<0.000000e+00> : vector<16x32xf32>
    %246 = tpu.matmul %243, %245, %cst_380 {dimension_numbers = #tpu.dot_dimension_numbers<[1], [0], [0], [1], [0, 0, 1, 1], [], []>} : vector<16x16xf32>, vector<16x32xf32>, vector<16x32xf32> -> vector<16x32xf32>
    %247 = arith.addf %240, %246 : vector<16x32xf32>
    %c0_381 = arith.constant 0 : index
    %c1_382 = arith.constant 1 : index
    %c0_383 = arith.constant 0 : index
    %c0_384 = arith.constant 0 : index
    %248 = vector.load %arg6[%c0_381, %c1_382, %c0_383, %c0_384] : memref<3x3x16x16xf32, #tpu.memory_space<vmem>>, vector<1x1x16x16xf32>
    %249 = vector.shape_cast %248 : vector<1x1x16x16xf32> to vector<16x16xf32>
    %cst_385 = arith.constant dense<0.000000e+00> : vector<16x16xf32>
    %250 = tpu.matmul %249, %179, %cst_385 {dimension_numbers = #tpu.dot_dimension_numbers<[1], [0], [0], [1], [0, 0, 1, 1], [], []>} : vector<16x16xf32>, vector<16x16xf32>, vector<16x16xf32> -> vector<16x16xf32>
    %c0_386 = arith.constant 0 : index
    %c1_387 = arith.constant 1 : index
    %c0_388 = arith.constant 0 : index
    %c0_389 = arith.constant 0 : index
    %251 = vector.load %arg4[%c0_386, %c1_387, %c0_388, %c0_389] : memref<3x3x16x32xf32, #tpu.memory_space<vmem>>, vector<1x1x16x32xf32>
    %252 = vector.shape_cast %251 : vector<1x1x16x32xf32> to vector<16x32xf32>
    %cst_390 = arith.constant dense<0.000000e+00> : vector<16x32xf32>
    %253 = tpu.matmul %250, %252, %cst_390 {dimension_numbers = #tpu.dot_dimension_numbers<[1], [0], [0], [1], [0, 0, 1, 1], [], []>} : vector<16x16xf32>, vector<16x32xf32>, vector<16x32xf32> -> vector<16x32xf32>
    %254 = arith.addf %247, %253 : vector<16x32xf32>
    %c0_391 = arith.constant 0 : index
    %c2_392 = arith.constant 2 : index
    %c0_393 = arith.constant 0 : index
    %c0_394 = arith.constant 0 : index
    %255 = vector.load %arg6[%c0_391, %c2_392, %c0_393, %c0_394] : memref<3x3x16x16xf32, #tpu.memory_space<vmem>>, vector<1x1x16x16xf32>
    %256 = vector.shape_cast %255 : vector<1x1x16x16xf32> to vector<16x16xf32>
    %cst_395 = arith.constant dense<0.000000e+00> : vector<16x16xf32>
    %257 = tpu.matmul %256, %239, %cst_395 {dimension_numbers = #tpu.dot_dimension_numbers<[1], [0], [0], [1], [0, 0, 1, 1], [], []>} : vector<16x16xf32>, vector<16x16xf32>, vector<16x16xf32> -> vector<16x16xf32>
    %c0_396 = arith.constant 0 : index
    %c2_397 = arith.constant 2 : index
    %c0_398 = arith.constant 0 : index
    %c0_399 = arith.constant 0 : index
    %258 = vector.load %arg4[%c0_396, %c2_397, %c0_398, %c0_399] : memref<3x3x16x32xf32, #tpu.memory_space<vmem>>, vector<1x1x16x32xf32>
    %259 = vector.shape_cast %258 : vector<1x1x16x32xf32> to vector<16x32xf32>
    %cst_400 = arith.constant dense<0.000000e+00> : vector<16x32xf32>
    %260 = tpu.matmul %257, %259, %cst_400 {dimension_numbers = #tpu.dot_dimension_numbers<[1], [0], [0], [1], [0, 0, 1, 1], [], []>} : vector<16x16xf32>, vector<16x32xf32>, vector<16x32xf32> -> vector<16x32xf32>
    %261 = arith.addf %254, %260 : vector<16x32xf32>
    %c1_401 = arith.constant 1 : index
    %c0_402 = arith.constant 0 : index
    %c0_403 = arith.constant 0 : index
    %c0_404 = arith.constant 0 : index
    %262 = vector.load %arg6[%c1_401, %c0_402, %c0_403, %c0_404] : memref<3x3x16x16xf32, #tpu.memory_space<vmem>>, vector<1x1x16x16xf32>
    %263 = vector.shape_cast %262 : vector<1x1x16x16xf32> to vector<16x16xf32>
    %cst_405 = arith.constant dense<0.000000e+00> : vector<16x16xf32>
    %264 = tpu.matmul %263, %119, %cst_405 {dimension_numbers = #tpu.dot_dimension_numbers<[1], [0], [0], [1], [0, 0, 1, 1], [], []>} : vector<16x16xf32>, vector<16x16xf32>, vector<16x16xf32> -> vector<16x16xf32>
    %c1_406 = arith.constant 1 : index
    %c0_407 = arith.constant 0 : index
    %c0_408 = arith.constant 0 : index
    %c0_409 = arith.constant 0 : index
    %265 = vector.load %arg4[%c1_406, %c0_407, %c0_408, %c0_409] : memref<3x3x16x32xf32, #tpu.memory_space<vmem>>, vector<1x1x16x32xf32>
    %266 = vector.shape_cast %265 : vector<1x1x16x32xf32> to vector<16x32xf32>
    %cst_410 = arith.constant dense<0.000000e+00> : vector<16x32xf32>
    %267 = tpu.matmul %264, %266, %cst_410 {dimension_numbers = #tpu.dot_dimension_numbers<[1], [0], [0], [1], [0, 0, 1, 1], [], []>} : vector<16x16xf32>, vector<16x32xf32>, vector<16x32xf32> -> vector<16x32xf32>
    %268 = arith.addf %261, %267 : vector<16x32xf32>
    %c1_411 = arith.constant 1 : index
    %c1_412 = arith.constant 1 : index
    %c0_413 = arith.constant 0 : index
    %c0_414 = arith.constant 0 : index
    %269 = vector.load %arg6[%c1_411, %c1_412, %c0_413, %c0_414] : memref<3x3x16x16xf32, #tpu.memory_space<vmem>>, vector<1x1x16x16xf32>
    %270 = vector.shape_cast %269 : vector<1x1x16x16xf32> to vector<16x16xf32>
    %cst_415 = arith.constant dense<0.000000e+00> : vector<16x16xf32>
    %271 = tpu.matmul %270, %59, %cst_415 {dimension_numbers = #tpu.dot_dimension_numbers<[1], [0], [0], [1], [0, 0, 1, 1], [], []>} : vector<16x16xf32>, vector<16x16xf32>, vector<16x16xf32> -> vector<16x16xf32>
    %c1_416 = arith.constant 1 : index
    %c1_417 = arith.constant 1 : index
    %c0_418 = arith.constant 0 : index
    %c0_419 = arith.constant 0 : index
    %272 = vector.load %arg4[%c1_416, %c1_417, %c0_418, %c0_419] : memref<3x3x16x32xf32, #tpu.memory_space<vmem>>, vector<1x1x16x32xf32>
    %273 = vector.shape_cast %272 : vector<1x1x16x32xf32> to vector<16x32xf32>
    %cst_420 = arith.constant dense<0.000000e+00> : vector<16x32xf32>
    %274 = tpu.matmul %271, %273, %cst_420 {dimension_numbers = #tpu.dot_dimension_numbers<[1], [0], [0], [1], [0, 0, 1, 1], [], []>} : vector<16x16xf32>, vector<16x32xf32>, vector<16x32xf32> -> vector<16x32xf32>
    %275 = arith.addf %268, %274 : vector<16x32xf32>
    %c1_421 = arith.constant 1 : index
    %c2_422 = arith.constant 2 : index
    %c0_423 = arith.constant 0 : index
    %c0_424 = arith.constant 0 : index
    %276 = vector.load %arg6[%c1_421, %c2_422, %c0_423, %c0_424] : memref<3x3x16x16xf32, #tpu.memory_space<vmem>>, vector<1x1x16x16xf32>
    %277 = vector.shape_cast %276 : vector<1x1x16x16xf32> to vector<16x16xf32>
    %cst_425 = arith.constant dense<0.000000e+00> : vector<16x16xf32>
    %278 = tpu.matmul %277, %119, %cst_425 {dimension_numbers = #tpu.dot_dimension_numbers<[1], [0], [0], [1], [0, 0, 1, 1], [], []>} : vector<16x16xf32>, vector<16x16xf32>, vector<16x16xf32> -> vector<16x16xf32>
    %c1_426 = arith.constant 1 : index
    %c2_427 = arith.constant 2 : index
    %c0_428 = arith.constant 0 : index
    %c0_429 = arith.constant 0 : index
    %279 = vector.load %arg4[%c1_426, %c2_427, %c0_428, %c0_429] : memref<3x3x16x32xf32, #tpu.memory_space<vmem>>, vector<1x1x16x32xf32>
    %280 = vector.shape_cast %279 : vector<1x1x16x32xf32> to vector<16x32xf32>
    %cst_430 = arith.constant dense<0.000000e+00> : vector<16x32xf32>
    %281 = tpu.matmul %278, %280, %cst_430 {dimension_numbers = #tpu.dot_dimension_numbers<[1], [0], [0], [1], [0, 0, 1, 1], [], []>} : vector<16x16xf32>, vector<16x32xf32>, vector<16x32xf32> -> vector<16x32xf32>
    %282 = arith.addf %275, %281 : vector<16x32xf32>
    %c2_431 = arith.constant 2 : index
    %c0_432 = arith.constant 0 : index
    %c0_433 = arith.constant 0 : index
    %c0_434 = arith.constant 0 : index
    %283 = vector.load %arg6[%c2_431, %c0_432, %c0_433, %c0_434] : memref<3x3x16x16xf32, #tpu.memory_space<vmem>>, vector<1x1x16x16xf32>
    %284 = vector.shape_cast %283 : vector<1x1x16x16xf32> to vector<16x16xf32>
    %cst_435 = arith.constant dense<0.000000e+00> : vector<16x16xf32>
    %285 = tpu.matmul %284, %239, %cst_435 {dimension_numbers = #tpu.dot_dimension_numbers<[1], [0], [0], [1], [0, 0, 1, 1], [], []>} : vector<16x16xf32>, vector<16x16xf32>, vector<16x16xf32> -> vector<16x16xf32>
    %c2_436 = arith.constant 2 : index
    %c0_437 = arith.constant 0 : index
    %c0_438 = arith.constant 0 : index
    %c0_439 = arith.constant 0 : index
    %286 = vector.load %arg4[%c2_436, %c0_437, %c0_438, %c0_439] : memref<3x3x16x32xf32, #tpu.memory_space<vmem>>, vector<1x1x16x32xf32>
    %287 = vector.shape_cast %286 : vector<1x1x16x32xf32> to vector<16x32xf32>
    %cst_440 = arith.constant dense<0.000000e+00> : vector<16x32xf32>
    %288 = tpu.matmul %285, %287, %cst_440 {dimension_numbers = #tpu.dot_dimension_numbers<[1], [0], [0], [1], [0, 0, 1, 1], [], []>} : vector<16x16xf32>, vector<16x32xf32>, vector<16x32xf32> -> vector<16x32xf32>
    %289 = arith.addf %282, %288 : vector<16x32xf32>
    %c2_441 = arith.constant 2 : index
    %c1_442 = arith.constant 1 : index
    %c0_443 = arith.constant 0 : index
    %c0_444 = arith.constant 0 : index
    %290 = vector.load %arg6[%c2_441, %c1_442, %c0_443, %c0_444] : memref<3x3x16x16xf32, #tpu.memory_space<vmem>>, vector<1x1x16x16xf32>
    %291 = vector.shape_cast %290 : vector<1x1x16x16xf32> to vector<16x16xf32>
    %cst_445 = arith.constant dense<0.000000e+00> : vector<16x16xf32>
    %292 = tpu.matmul %291, %179, %cst_445 {dimension_numbers = #tpu.dot_dimension_numbers<[1], [0], [0], [1], [0, 0, 1, 1], [], []>} : vector<16x16xf32>, vector<16x16xf32>, vector<16x16xf32> -> vector<16x16xf32>
    %c2_446 = arith.constant 2 : index
    %c1_447 = arith.constant 1 : index
    %c0_448 = arith.constant 0 : index
    %c0_449 = arith.constant 0 : index
    %293 = vector.load %arg4[%c2_446, %c1_447, %c0_448, %c0_449] : memref<3x3x16x32xf32, #tpu.memory_space<vmem>>, vector<1x1x16x32xf32>
    %294 = vector.shape_cast %293 : vector<1x1x16x32xf32> to vector<16x32xf32>
    %cst_450 = arith.constant dense<0.000000e+00> : vector<16x32xf32>
    %295 = tpu.matmul %292, %294, %cst_450 {dimension_numbers = #tpu.dot_dimension_numbers<[1], [0], [0], [1], [0, 0, 1, 1], [], []>} : vector<16x16xf32>, vector<16x32xf32>, vector<16x32xf32> -> vector<16x32xf32>
    %296 = arith.addf %289, %295 : vector<16x32xf32>
    %c2_451 = arith.constant 2 : index
    %c2_452 = arith.constant 2 : index
    %c0_453 = arith.constant 0 : index
    %c0_454 = arith.constant 0 : index
    %297 = vector.load %arg6[%c2_451, %c2_452, %c0_453, %c0_454] : memref<3x3x16x16xf32, #tpu.memory_space<vmem>>, vector<1x1x16x16xf32>
    %298 = vector.shape_cast %297 : vector<1x1x16x16xf32> to vector<16x16xf32>
    %cst_455 = arith.constant dense<0.000000e+00> : vector<16x16xf32>
    %299 = tpu.matmul %298, %239, %cst_455 {dimension_numbers = #tpu.dot_dimension_numbers<[1], [0], [0], [1], [0, 0, 1, 1], [], []>} : vector<16x16xf32>, vector<16x16xf32>, vector<16x16xf32> -> vector<16x16xf32>
    %c2_456 = arith.constant 2 : index
    %c2_457 = arith.constant 2 : index
    %c0_458 = arith.constant 0 : index
    %c0_459 = arith.constant 0 : index
    %300 = vector.load %arg4[%c2_456, %c2_457, %c0_458, %c0_459] : memref<3x3x16x32xf32, #tpu.memory_space<vmem>>, vector<1x1x16x32xf32>
    %301 = vector.shape_cast %300 : vector<1x1x16x32xf32> to vector<16x32xf32>
    %cst_460 = arith.constant dense<0.000000e+00> : vector<16x32xf32>
    %302 = tpu.matmul %299, %301, %cst_460 {dimension_numbers = #tpu.dot_dimension_numbers<[1], [0], [0], [1], [0, 0, 1, 1], [], []>} : vector<16x16xf32>, vector<16x32xf32>, vector<16x32xf32> -> vector<16x32xf32>
    %303 = arith.addf %296, %302 : vector<16x32xf32>
    %c0_461 = arith.constant 0 : index
    %c0_462 = arith.constant 0 : index
    %304 = vector.load %arg5[%c0_461, %c0_462] : memref<1x32xf32, #tpu.memory_space<vmem>>, vector<1x32xf32>
    %305 = vector.broadcast %304 : vector<1x32xf32> to vector<16x32xf32>
    %306 = arith.addf %303, %305 : vector<16x32xf32>
    %cst_463 = arith.constant 0.000000e+00 : f32
    %307 = vector.broadcast %cst_463 : f32 to vector<16x32xf32>
    %308 = arith.maximumf %306, %307 : vector<16x32xf32>
    %c0_464 = arith.constant 0 : index
    %c0_465 = arith.constant 0 : index
    %c0_466 = arith.constant 0 : index
    %309 = vector.load %arg7[%c0_464, %c0_465, %c0_466] : memref<1x16x32xf32, #tpu.memory_space<vmem>>, vector<1x16x32xf32>
    %310 = vector.shape_cast %309 : vector<1x16x32xf32> to vector<16x32xf32>
    %311 = vector.shape_cast %308 : vector<16x32xf32> to vector<1x16x32xf32>
    tpu.vector_store %arg7[%c0_464, %c0_465, %c0_466], %311 {strides = array<i32>} : memref<1x16x32xf32, #tpu.memory_space<vmem>>, vector<1x16x32xf32>,
    return
  }
  func.func @transform_0(%arg0: i32) -> (i32, i32, i32, i32, i32) {
    %c0_i32 = arith.constant 0 : i32
    %c0_i32_0 = arith.constant 0 : i32
    %c0_i32_1 = arith.constant 0 : i32
    %c0_i32_2 = arith.constant 0 : i32
    %c0_i32_3 = arith.constant 0 : i32
    return %arg0, %c0_i32, %c0_i32_0, %c0_i32_1, %c0_i32_2 : i32, i32, i32, i32, i32
  }
  func.func @transform_1(%arg0: i32) -> (i32, i32, i32, i32) {
    %c0_i32 = arith.constant 0 : i32
    %c0_i32_0 = arith.constant 0 : i32
    %c0_i32_1 = arith.constant 0 : i32
    %c0_i32_2 = arith.constant 0 : i32
    %c0_i32_3 = arith.constant 0 : i32
    return %c0_i32, %c0_i32_0, %c0_i32_1, %c0_i32_2 : i32, i32, i32, i32
  }
  func.func @transform_2(%arg0: i32) -> (i32, i32) {
    %c0_i32 = arith.constant 0 : i32
    %c0_i32_0 = arith.constant 0 : i32
    %c0_i32_1 = arith.constant 0 : i32
    return %c0_i32, %c0_i32_0 : i32, i32
  }
  func.func @transform_3(%arg0: i32) -> (i32, i32, i32, i32) {
    %c0_i32 = arith.constant 0 : i32
    %c0_i32_0 = arith.constant 0 : i32
    %c0_i32_1 = arith.constant 0 : i32
    %c0_i32_2 = arith.constant 0 : i32
    %c0_i32_3 = arith.constant 0 : i32
    return %c0_i32, %c0_i32_0, %c0_i32_1, %c0_i32_2 : i32, i32, i32, i32
  }
  func.func @transform_4(%arg0: i32) -> (i32, i32) {
    %c0_i32 = arith.constant 0 : i32
    %c0_i32_0 = arith.constant 0 : i32
    %c0_i32_1 = arith.constant 0 : i32
    return %c0_i32, %c0_i32_0 : i32, i32
  }
  func.func @transform_5(%arg0: i32) -> (i32, i32, i32, i32) {
    %c0_i32 = arith.constant 0 : i32
    %c0_i32_0 = arith.constant 0 : i32
    %c0_i32_1 = arith.constant 0 : i32
    %c0_i32_2 = arith.constant 0 : i32
    %c0_i32_3 = arith.constant 0 : i32
    return %c0_i32, %c0_i32_0, %c0_i32_1, %c0_i32_2 : i32, i32, i32, i32
  }
  func.func @transform_6(%arg0: i32) -> (i32, i32, i32) {
    %c0_i32 = arith.constant 0 : i32
    %c0_i32_0 = arith.constant 0 : i32
    %c0_i32_1 = arith.constant 0 : i32
    return %arg0, %c0_i32, %c0_i32_0 : i32, i32, i32
  }
}

</mosaic_0001>

<bundles_post_ra>
// kernel: tpu_custom_call.1
= control target key start
LH: loop header
LB: loop body
LE: loop exit
PB: predicated region body
PF: predicated region fallthrough
CT: control target
= control target key end

     0   :  { %11 = vsyncpa [#allocation3], 0  ;;  %s3031_s0 = inlined_call_operand.vmem [shape: f32[2,5,5,16,4], index: 0, kind: input, shape index: {}]   ;;  %s3032_s1 = inlined_call_operand.vmem [shape: f32[3,3,4,16], index: 1, kind: input, shape index: {}]   ;;  %s3033_s2 = inlined_call_operand.vmem [shape: f32[1,16], index: 2, kind: input, shape index: {}]   ;;  %s3034_s3 = inlined_call_operand.vmem [shape: f32[3,3,16,32], index: 3, kind: input, shape index: {}]   ;;  %s3035_s4 = inlined_call_operand.vmem [shape: f32[1,32], index: 4, kind: input, shape index: {}]   ;;  %s3036_s5 = inlined_call_operand.vmem [shape: f32[3,3,16,16], index: 5, kind: input, shape index: {}]   ;;  %s3037_s6 = inlined_call_operand.hbm [shape: f32[2,16,32], index: 6, kind: output, shape index: {}]  }
   0x1   :  { %13 = vsyncpa [#allocation3 + $0x1], 0  ;;  %s2493_s21 = smov 0   ;;  %s2495_s22 = smov 0  }
   0x2   :  { %s2497_s23 = smov 0   ;;  %s2499_s24 = smov 0  }
   0x3 LB: > { %s2514_s25 = sadd.s32 4294967295, %s2454_s24   ;;  %s2102_s26 = sadd.s32 4294967294, %s2454_s24   ;;  %s2454_s24 = sphi %s2499_s24, %s3043_s24   ;;  %s2450_s23 = sphi %s2497_s23, %s3042_s23   ;;  %s2446_s22 = sphi %s2495_s22, %s3041_s22   ;;  %s2442_s21 = sphi %s2493_s21, %s3040_s21  }
   0x4   : > { %s2518_s27 = sadd.s32 1, %s2454_s24   ;;  %s157_s28 = sadd.s32 1, %s2450_s23 }
   0x5   : > { %s154_s29 = ssub.s32 %s2454_s24, %s2518_s27  ;;  %p167_p0 = scmp.ne.s32.totalorder %s2450_s23, %s2446_s22 }
   0x6   : > { %p155_p1 = scmp.eq.s32.totalorder %s154_s29, 0  ;;  %p168_p2 = scmp.eq.s32.totalorder %s2514_s25, 1 }
   0x7   : > { %p173_p3 = scmp.ne.s32.totalorder %s2446_s22, %s2442_s21  ;;  %p174_p4 = scmp.eq.s32.totalorder %s2102_s26, 1 }
   0x8   : > { %s2529_s30 = scalar_select %p155_p1, %s2450_s23, %s157_s28  }
   0x9   : > { %p2531_p5 = por %p168_p2, %p167_p0  ;;  %p2535_p6 = por %p174_p4, %p173_p3 }
   0xa   : > { %p2105_p7 = scmp.ge.s32.totalorder %s2454_s24, 1  ;;  %p215_p8 = scmp.lt.s32.totalorder %s2454_s24, 3 }
   0xc   : > { %p216_p9 = pnand %p2105_p7, %p215_p8 }
   0xd   : > { %p245_p10 = scmp.lt.s32.totalorder (!%p216_p9), %s2514_s25, 1  ;;  %s242_s16 = sand.u32 (!%p216_p9), 1, %s2446_s22  }
   0xe   : > { %219 = sbr.rel (%p216_p9) target bundleno = 736 (0x2e0), region = 44  ;;  %s2106_s19 = sshll.u32 (!%p216_p9), %s242_s16, 4 }
   0xf   : > { %s2345_s20 = sshll.u32 (!%p216_p9), %s2514_s25, 4  ;;  %s244_s9 = scalar_lea.vmem (!%p216_p9), [#allocation2], %s2106_s19 }
  0x10   : > { %s2036_s29 = scalar_lea.hbm (!%p216_p9), %s3037_s6, %s2345_s20 }
  0x11   : > { %s2039_s11 = sshll.u32 (!%p216_p9), %s2036_s29, 4  ;;  %s2040_s11 = int_to_ptr.hbm [resolvable:$true] %s2039_s11 }
  0x12   : > { %s2406_s12 = sshra.s32 (!%p216_p9), %s2040_s11, 4  ;;  %s2407_s12 = int_to_ptr.hbm [resolvable:$true] %s2406_s12 }
  0x13   : > { %v2544_v0 = vld [vmem:[%s3032_s1 + $0x4] sm:$0xf]  ;;  %vm265_vm0 = vcmask 1043456   ;;  %v2549_v1 = vld [vmem:[%s3032_s1] sm:$0xf]  ;;  %s246_s17 = scalar_select %p245_p10, %s2514_s25, 1 }
  0x14   : > { %2346 = vmatpush.msk.msra.mxu2 %vm265_vm0, %v2544_v0  ;;  %2347 = vmatpush.msk.msra.mxu3 %vm265_vm0, %v2549_v1  ;;  %v2559_v2 = vld [vmem:[%s3032_s1 + $0x8] sm:$0xf]  ;;  %v2564_v3 = vld [vmem:[%s3032_s1 + $0xc] sm:$0xf]  ;;  %v2574_v4 = vld [vmem:[%s3032_s1 + $0x10] sm:$0xf]  ;;  %p2413_p0 = scmp.lt.s32.totalorder %s2407_s12, %s3037_s6 }
  0x15   : > { %2111 = vmatpush.msk.msra.mxu0 %vm265_vm0, %v2544_v0  ;;  %v2579_v5 = vld [vmem:[%s3032_s1 + $0x14] sm:$0xf]  ;;  %2114 = vmatpush.msk.msra.mxu1 %vm265_vm0, %v2549_v1  ;;  %s2348_s28 = smul.u32 400, %s246_s17  ;;  %vm258_vm1 = vcmask 31744   ;;  %v2597_v6 = vld [vmem:[%s3032_s1 + $0x18] sm:$0xf] }
  0x16   : > { %2120 = vmatpush.msk.msrb.mxu2 %vm265_vm0, %v2559_v2  ;;  %2126 = vmatpush.msk.msrb.mxu3 %vm265_vm0, %v2564_v3  ;;  %v2602_v7 = vld [vmem:[%s3032_s1 + $0x1c] sm:$0xf]  ;;  %v2613_v12 = vld [vmem:[%s3032_s1 + $0x20] sm:$0xf]  ;;  %vm1426_vm2 = vcmask 130048   ;;  %vm2021_vm3 = vcmask 261120  }
  0x17   : > { %2132 = vmatpush.msk.msrb.mxu0 %vm265_vm0, %v2574_v4  ;;  %2138 = vmatpush.msk.msrb.mxu1 %vm265_vm0, %v2579_v5  ;;  %s2592_s10 = scalar_lea.vmem %s3031_s0, %s2348_s28  ;;  %s2025_s25 = scalar_lea.sflag [#allocation3], %s242_s16 }
  0x18   : > { %v2109_v8 = vld [vmem:[%s2592_s10 + $0x18] sm:$0xff]  ;;  %v251_v9 = vld [vmem:[%s2592_s10 + $0x8] sm:$0xff]  ;;  %v2108_v10 = vld [vmem:[%s2592_s10 + $0x10] sm:$0xff]  ;;  %s2408_s13 = scalar_lea.hbm %s2407_s12, 16  ;;  %s2412_s17 = scalar_lea.hbm %s3037_s6, 32 }
  0x19   : > { %2113 = vmatmul.msk.f32.vlgmr.msra.gmra.mxu2 %vm258_vm1, %v2109_v8  ;;  %2116 = vmatmul.msk.f32.vlgmr.msra.gmra.mxu3 %vm258_vm1, %v251_v9  ;;  %v250_v11 = vld [vmem:[%s2592_s10] sm:$0xff]  ;;  %v2123_v14 = vld [vmem:[%s2592_s10 + $0x50] sm:$0xff]  ;;  %v2118_v17 = vld [vmem:[%s2592_s10 + $0x28] sm:$0xff]  ;;  %p2409_p11 = scmp.ne.s32.totalorder %s2407_s12, %s2408_s13  ;;  %p2414_p1 = scmp.lt.s32.totalorder %s2412_s17, %s2408_s13 }
  0x1a   : > { %2112 = vmatmul.msk.f32.vlgmr.msra.gmra.mxu0 %vm258_vm1, %v2108_v10  ;;  %2115 = vmatmul.msk.f32.vlgmr.msra.gmra.mxu1 %vm258_vm1, %v250_v11  ;;  %v2117_v13 = vld [vmem:[%s2592_s10 + $0x20] sm:$0xff]  ;;  %v2135_v16 = vld [vmem:[%s2592_s10 + $0x70] sm:$0xff]  ;;  %v2124_v18 = vld [vmem:[%s2592_s10 + $0x58] sm:$0xff] }
  0x1b   : > { %2144 = vmatpush.msk.msra.mxu2 %vm265_vm0, %v2597_v6  ;;  %2150 = vmatpush.msk.msra.mxu3 %vm265_vm0, %v2602_v7  ;;  %v2129_v15 = vld [vmem:[%s2592_s10 + $0x60] sm:$0xff]  ;;  %v2130_v19 = vld [vmem:[%s2592_s10 + $0x68] sm:$0xff]  ;;  %v2136_v20 = vld [vmem:[%s2592_s10 + $0x78] sm:$0xff]  ;;  %p2410_p12 = pnand %p2409_p11, %p2531_p5  ;;  %p2415_p2 = por %p2414_p1, %p2413_p0 }
  0x1c   : > { %2156 = vmatpush.msk.msra.mxu0 %vm265_vm0, %v2613_v12  ;;  %2161 = vmatpush.msk.msra.mxu1 %vm265_vm0, %v2544_v0  ;;  %v2141_v21 = vld [vmem:[%s2592_s10 + $0xa0] sm:$0xff]  ;;  %v2147_v22 = vld [vmem:[%s2592_s10 + $0xb0] sm:$0xff]  ;;  %v2142_v25 = vld [vmem:[%s2592_s10 + $0xa8] sm:$0xff] }
  0x1d   : > { %v2652_v23 = vld [vmem:[%s2592_s10 + $0xc0] sm:$0xff]  ;;  %v2159_v24 = vld [vmem:[%s2592_s10 + $0x30] sm:$0xff]  ;;  %v2148_v26 = vld [vmem:[%s2592_s10 + $0xb8] sm:$0xff]  ;;  %p2411_p13 = pneg %p2410_p12 }
  0x1e   : > { %v2671_v27 = vld [vmem:[%s2592_s10 + $0xc8] sm:$0xff]  ;;  %v2160_v28 = vld [vmem:[%s2592_s10 + $0x38] sm:$0xff]  ;;  %v2167_v29 = vld [vmem:[%s2592_s10 + $0x40] sm:$0xff] }
  0x1f   : > { %v2175_v30 = vld [vmem:[%s2592_s10 + $0x80] sm:$0xff]  ;;  %v2168_v31 = vld [vmem:[%s2592_s10 + $0x48] sm:$0xff]  ;;  %v2180_v33 = vld [vmem:[%s2592_s10 + $0x90] sm:$0xff]  ;;  %p2416_p3 = pnand %p2415_p2, %p2411_p13 }
  0x20   : > { %v2176_v32 = vld [vmem:[%s2592_s10 + $0x88] sm:$0xff]  ;;  %v2188_v34 = vld [vmem:[%s2592_s10 + $0xd0] sm:$0xff]  ;;  %v2193_v35 = vld [vmem:[%s2592_s10 + $0xe0] sm:$0xff] }
  0x21   : > { %2121 = vmatmul.msk.f32.vlgmr.msrb.gmra.mxu2 %vm258_vm1, %v2117_v13  ;;  %2127 = vmatmul.msk.f32.vlgmr.msrb.gmra.mxu3 %vm258_vm1, %v2123_v14  ;;  %v2181_v36 = vld [vmem:[%s2592_s10 + $0x98] sm:$0xff]  ;;  %v2194_v38 = vld [vmem:[%s2592_s10 + $0xe8] sm:$0xff]  ;;  %v2207_v39 = vld [vmem:[%s2592_s10 + $0xf0] sm:$0xff] }
  0x22   : > { %2133 = vmatmul.msk.f32.vlgmr.msrb.gmra.mxu0 %vm258_vm1, %v2129_v15  ;;  %2139 = vmatmul.msk.f32.vlgmr.msrb.gmra.mxu1 %vm258_vm1, %v2135_v16  ;;  %v2189_v37 = vld [vmem:[%s2592_s10 + $0xd8] sm:$0xff]  ;;  %v2212_v41 = vld [vmem:[%s2592_s10 + $0x100] sm:$0xff]  ;;  %v2217_v42 = vld [vmem:[%s2592_s10 + $0x110] sm:$0xff] }
  0x23   : > { %2164 = vmatpush.msk.msrb.mxu2 %vm265_vm0, %v2549_v1  ;;  %2169 = vmatpush.msk.msrb.mxu3 %vm265_vm0, %v2559_v2  ;;  %v2208_v40 = vld [vmem:[%s2592_s10 + $0xf8] sm:$0xff]  ;;  %v2222_v43 = vld [vmem:[%s2592_s10 + $0x140] sm:$0xff]  ;;  %v2227_v44 = vld [vmem:[%s2592_s10 + $0x150] sm:$0xff] }
  0x24   : > { %2172 = vmatpush.msk.msrb.mxu0 %vm265_vm0, %v2564_v3  ;;  %2177 = vmatpush.msk.msrb.mxu1 %vm265_vm0, %v2574_v4  ;;  %v2213_v45 = vld [vmem:[%s2592_s10 + $0x108] sm:$0xff]  ;;  %v2218_v46 = vld [vmem:[%s2592_s10 + $0x118] sm:$0xff]  ;;  %v2232_v49 = vld [vmem:[%s2592_s10 + $0x160] sm:$0xff] }
  0x25   : > { %v2223_v47 = vld [vmem:[%s2592_s10 + $0x148] sm:$0xff]  ;;  %v2228_v48 = vld [vmem:[%s2592_s10 + $0x158] sm:$0xff]  ;;  %v2249_v51 = vld [vmem:[%s2592_s10 + $0x120] sm:$0xff] }
  0x26   : > { %v2233_v50 = vld [vmem:[%s2592_s10 + $0x168] sm:$0xff]  ;;  %v2254_v52 = vld [vmem:[%s2592_s10 + $0x130] sm:$0xff]  ;;  %v2255_v56 = vld [vmem:[%s2592_s10 + $0x138] sm:$0xff] }
  0x27   : > { %v2250_v53 = vld [vmem:[%s2592_s10 + $0x128] sm:$0xff]  ;;  %v2262_v59 = vld [vmem:[%s2592_s10 + $0x170] sm:$0xff]  ;;  %v2267_v60 = vld [vmem:[%s2592_s10 + $0x180] sm:$0xff] }
  0x29   : > { %2122 = vmatmul.msk.f32.gmra.mxu2 %vm258_vm1, %v2118_v17  ;;  %2128 = vmatmul.msk.f32.gmra.mxu3 %vm258_vm1, %v2124_v18 }
  0x2a   : > { %2134 = vmatmul.msk.f32.gmra.mxu0 %vm258_vm1, %v2130_v19  ;;  %2140 = vmatmul.msk.f32.gmra.mxu1 %vm258_vm1, %v2136_v20 }
  0x31   : > { %2145 = vmatmul.msk.f32.vlgmr.msra.gmra.mxu2 %vm258_vm1, %v2141_v21  ;;  %2151 = vmatmul.msk.f32.vlgmr.msra.gmra.mxu3 %vm258_vm1, %v2147_v22 }
  0x32   : > { %2157 = vmatmul.msk.f32.vlgmr.msra.gmra.mxu0 %vm258_vm1, %v2652_v23  ;;  %2162 = vmatmul.msk.f32.vlgmr.msra.gmra.mxu1 %vm258_vm1, %v2159_v24 }
  0x33   : > { %2182 = vmatpush.msk.msra.mxu2 %vm265_vm0, %v2579_v5  ;;  %2185 = vmatpush.msk.msra.mxu3 %vm265_vm0, %v2597_v6 }
  0x34   : > { %2190 = vmatpush.msk.msra.mxu0 %vm265_vm0, %v2602_v7  ;;  %2195 = vmatpush.msk.msra.mxu1 %vm265_vm0, %v2613_v12 }
  0x39   : > { %2146 = vmatmul.msk.f32.gmra.mxu2 %vm258_vm1, %v2142_v25  ;;  %2152 = vmatmul.msk.f32.gmra.mxu3 %vm258_vm1, %v2148_v26 }
  0x3a   : > { %2158 = vmatmul.msk.f32.gmra.mxu0 %vm258_vm1, %v2671_v27  ;;  %2163 = vmatmul.msk.f32.gmra.mxu1 %vm258_vm1, %v2160_v28 }
  0x41   : > { %2165 = vmatmul.msk.f32.vlgmr.msrb.gmra.mxu2 %vm258_vm1, %v2117_v13  ;;  %2170 = vmatmul.msk.f32.vlgmr.msrb.gmra.mxu3 %vm258_vm1, %v2167_v29 }
  0x42   : > { %2173 = vmatmul.msk.f32.vlgmr.msrb.gmra.mxu0 %vm258_vm1, %v2135_v16  ;;  %2178 = vmatmul.msk.f32.vlgmr.msrb.gmra.mxu1 %vm258_vm1, %v2175_v30 }
  0x43   : > { %2198 = vmatpush.msk.msrb.mxu2 %vm265_vm0, %v2544_v0  ;;  %2201 = vmatpush.msk.msrb.mxu3 %vm265_vm0, %v2549_v1 }
  0x44   : > { %2204 = vmatpush.msk.msrb.mxu0 %vm265_vm0, %v2559_v2  ;;  %2209 = vmatpush.msk.msrb.mxu1 %vm265_vm0, %v2564_v3 }
  0x49   : > { %2166 = vmatmul.msk.f32.gmra.mxu2 %vm258_vm1, %v2118_v17  ;;  %2171 = vmatmul.msk.f32.gmra.mxu3 %vm258_vm1, %v2168_v31 }
  0x4a   : > { %2174 = vmatmul.msk.f32.gmra.mxu0 %vm258_vm1, %v2136_v20  ;;  %2179 = vmatmul.msk.f32.gmra.mxu1 %vm258_vm1, %v2176_v32 }
  0x51   : > { %2183 = vmatmul.msk.f32.vlgmr.msra.gmra.mxu2 %vm258_vm1, %v2180_v33  ;;  %2186 = vmatmul.msk.f32.vlgmr.msra.gmra.mxu3 %vm258_vm1, %v2652_v23 }
  0x52   : > { %2191 = vmatmul.msk.f32.vlgmr.msra.gmra.mxu0 %vm258_vm1, %v2188_v34  ;;  %2196 = vmatmul.msk.f32.vlgmr.msra.gmra.mxu1 %vm258_vm1, %v2193_v35 }
  0x53   : > { %2214 = vmatpush.msk.msra.mxu2 %vm265_vm0, %v2574_v4  ;;  %2219 = vmatpush.msk.msra.mxu3 %vm265_vm0, %v2579_v5 }
  0x54   : > { %2224 = vmatpush.msk.msra.mxu0 %vm265_vm0, %v2597_v6  ;;  %2229 = vmatpush.msk.msra.mxu1 %vm265_vm0, %v2602_v7 }
  0x59   : > { %2184 = vmatmul.msk.f32.gmra.mxu2 %vm258_vm1, %v2181_v36  ;;  %2187 = vmatmul.msk.f32.gmra.mxu3 %vm258_vm1, %v2671_v27 }
  0x5a   : > { %2192 = vmatmul.msk.f32.gmra.mxu0 %vm258_vm1, %v2189_v37  ;;  %2197 = vmatmul.msk.f32.gmra.mxu1 %vm258_vm1, %v2194_v38 }
  0x61   : > { %2199 = vmatmul.msk.f32.vlgmr.msrb.gmra.mxu2 %vm258_vm1, %v2147_v22  ;;  %2202 = vmatmul.msk.f32.vlgmr.msrb.gmra.mxu3 %vm258_vm1, %v2141_v21 }
  0x62   : > { %2205 = vmatmul.msk.f32.vlgmr.msrb.gmra.mxu0 %vm258_vm1, %v2652_v23  ;;  %2210 = vmatmul.msk.f32.vlgmr.msrb.gmra.mxu1 %vm258_vm1, %v2207_v39  ;;  %v2278_v39 = vld [vmem:[%s3034_s3 + $0x10] sm:$0xff] }
  0x63   : > { %2234 = vmatpush.msk.msrb.mxu2 %vm265_vm0, %v2613_v12  ;;  %2237 = vmatpush.msk.msrb.mxu3 %vm265_vm0, %v2544_v0 }
  0x64   : > { %2240 = vmatpush.msk.msrb.mxu0 %vm265_vm0, %v2549_v1  ;;  %2243 = vmatpush.msk.msrb.mxu1 %vm265_vm0, %v2559_v2  ;;  %v2263_v2 = vld [vmem:[%s2592_s10 + $0x178] sm:$0xff] }
  0x69   : > { %2200 = vmatmul.msk.f32.gmra.mxu2 %vm258_vm1, %v2148_v26  ;;  %2203 = vmatmul.msk.f32.gmra.mxu3 %vm258_vm1, %v2142_v25 }
  0x6a   : > { %2206 = vmatmul.msk.f32.gmra.mxu0 %vm258_vm1, %v2671_v27  ;;  %2211 = vmatmul.msk.f32.gmra.mxu1 %vm258_vm1, %v2208_v40 }
  0x71   : > { %2215 = vmatmul.msk.f32.vlgmr.msra.gmra.mxu2 %vm258_vm1, %v2212_v41  ;;  %2220 = vmatmul.msk.f32.vlgmr.msra.gmra.mxu3 %vm258_vm1, %v2217_v42 }
  0x72   : > { %2225 = vmatmul.msk.f32.vlgmr.msra.gmra.mxu0 %vm258_vm1, %v2222_v43  ;;  %2230 = vmatmul.msk.f32.vlgmr.msra.gmra.mxu1 %vm258_vm1, %v2227_v44 }
  0x73   : > { %2246 = vmatpush.msk.msra.mxu2 %vm265_vm0, %v2564_v3  ;;  %2251 = vmatpush.msk.msra.mxu3 %vm265_vm0, %v2574_v4  ;;  %v2268_v3 = vld [vmem:[%s2592_s10 + $0x188] sm:$0xff]  ;;  %s2037_s10 = sshll.u32 %s244_s9, 4  ;;  %s2038_s10 = int_to_ptr.vmem [resolvable:$true] %s2037_s10 }
  0x74   : > { %2256 = vmatpush.msk.msra.mxu0 %vm265_vm0, %v2579_v5  ;;  %2259 = vmatpush.msk.msra.mxu1 %vm265_vm0, %v2597_v6 }
  0x79   : > { %2216 = vmatmul.msk.f32.gmra.mxu2 %vm258_vm1, %v2213_v45  ;;  %2221 = vmatmul.msk.f32.gmra.mxu3 %vm258_vm1, %v2218_v46 }
  0x7a   : > { %2226 = vmatmul.msk.f32.gmra.mxu0 %vm258_vm1, %v2223_v47  ;;  %2231 = vmatmul.msk.f32.gmra.mxu1 %vm258_vm1, %v2228_v48 }
  0x81   : > { %2235 = vmatmul.msk.f32.vlgmr.msrb.gmra.mxu2 %vm258_vm1, %v2232_v49  ;;  %2238 = vmatmul.msk.f32.vlgmr.msrb.gmra.mxu3 %vm258_vm1, %v2188_v34 }
  0x82   : > { %2241 = vmatmul.msk.f32.vlgmr.msrb.gmra.mxu0 %vm258_vm1, %v2652_v23  ;;  %2244 = vmatmul.msk.f32.vlgmr.msrb.gmra.mxu1 %vm258_vm1, %v2193_v35  ;;  %v2279_v35 = vld [vmem:[%s3034_s3 + $0x18] sm:$0xff] }
  0x83   : > { %2264 = vmatpush.msk.msrb.mxu2 %vm265_vm0, %v2602_v7  ;;  %2269 = vmatpush.msk.msrb.mxu3 %vm265_vm0, %v2613_v12 }
  0x89   : > { %2236 = vmatmul.msk.f32.gmra.mxu2 %vm258_vm1, %v2233_v50  ;;  %2239 = vmatmul.msk.f32.gmra.mxu3 %vm258_vm1, %v2189_v37 }
  0x8a   : > { %2242 = vmatmul.msk.f32.gmra.mxu0 %vm258_vm1, %v2671_v27  ;;  %2245 = vmatmul.msk.f32.gmra.mxu1 %vm258_vm1, %v2194_v38 }
  0x91   : > { %2247 = vmatmul.msk.f32.vlgmr.msra.gmra.mxu2 %vm258_vm1, %v2217_v42  ;;  %2252 = vmatmul.msk.f32.vlgmr.msra.gmra.mxu3 %vm258_vm1, %v2249_v51 }
  0x92   : > { %2257 = vmatmul.msk.f32.vlgmr.msra.gmra.mxu0 %vm258_vm1, %v2254_v52  ;;  %2260 = vmatmul.msk.f32.vlgmr.msra.gmra.mxu1 %vm258_vm1, %v2232_v49 }
  0x93   : > { %1513 = vmatpush.msra.mxu2 %v2279_v35 }
  0x95   : > { %1514 = vmatpush.msra.mxu2 %v2278_v39 }
  0x97   : > { %v286_v54 = vpop.f32.mrf.mxu0  ;;  %v318_v55 = vpop.f32.mrf.mxu1 }
  0x98   : > { %v319_v63 = vadd.f32 %v318_v55, %v286_v54 }
  0x99   : > { %2248 = vmatmul.msk.f32.gmra.mxu2 %vm258_vm1, %v2218_v46  ;;  %2253 = vmatmul.msk.f32.gmra.mxu3 %vm258_vm1, %v2250_v53 }
  0x9a   : > { %2258 = vmatmul.msk.f32.gmra.mxu0 %vm258_vm1, %v2255_v56  ;;  %2261 = vmatmul.msk.f32.gmra.mxu1 %vm258_vm1, %v2233_v50 }
  0x9c   : > { %v289_v57 = vpop.f32.mrf.mxu2  ;;  %v321_v58 = vpop.f32.mrf.mxu3 }
  0x9d   : > { %v322_v10 = vadd.f32 %v321_v58, %v289_v57 }
  0x9f   : > { %v433_v61 = vpop.f32.mrf.mxu0  ;;  %v472_v62 = vpop.f32.mrf.mxu1 }
  0xa1   : > { %2265 = vmatmul.msk.f32.vlgmr.msrb.gmra.mxu2 %vm258_vm1, %v2262_v59  ;;  %2270 = vmatmul.msk.f32.vlgmr.msrb.gmra.mxu3 %vm258_vm1, %v2267_v60 }
  0xa4   : > { %v355_v0 = vpop.f32.mrf.mxu2  ;;  %v394_v1 = vpop.f32.mrf.mxu3 }
  0xa5   : > { %v361_v4 = vadd.f32 %v355_v0, %v319_v63 }
  0xa7   : > { %v436_v5 = vpop.f32.mrf.mxu0  ;;  %v475_v6 = vpop.f32.mrf.mxu1  ;;  %v400_v7 = vadd.f32 %v394_v1, %v361_v4  ;;  %v2816_v1 = vld [vmem:[%s3033_s2] ss:$0 sm:$0xff] }
  0xa9   : > { %2266 = vmatmul.msk.f32.gmra.mxu2 %vm258_vm1, %v2263_v2  ;;  %2271 = vmatmul.msk.f32.gmra.mxu3 %vm258_vm1, %v2268_v3  ;;  %v439_v11 = vadd.f32 %v433_v61, %v400_v7 }
  0xab   : > { %v478_v15 = vadd.f32 %v472_v62, %v439_v11 }
  0xac   : > { %v358_v8 = vpop.f32.mrf.mxu2  ;;  %v397_v9 = vpop.f32.mrf.mxu3 }
  0xad   : > { %v362_v12 = vadd.f32 %v358_v8, %v322_v10 }
  0xaf   : > { %v589_v13 = vpop.f32.mrf.mxu0  ;;  %v631_v14 = vpop.f32.mrf.mxu1  ;;  %v401_v16 = vadd.f32 %v397_v9, %v362_v12 }
  0xb1   : > { %v440_v20 = vadd.f32 %v436_v5, %v401_v16 }
  0xb3   : > { %v479_v25 = vadd.f32 %v475_v6, %v440_v20 }
  0xb4   : > { %v511_v17 = vpop.f32.mrf.mxu2  ;;  %v550_v18 = vpop.f32.mrf.mxu3 }
  0xb5   : > { %v517_v19 = vadd.f32 %v511_v17, %v478_v15 }
  0xb7   : > { %v556_v21 = vadd.f32 %v550_v18, %v517_v19  ;;  %v592_v22 = vpop.f32.mrf.mxu0  ;;  %v634_v23 = vpop.f32.mrf.mxu1 }
  0xb9   : > { %v2803_v24 = vadd.f32 %v589_v13, %v556_v21 }
  0xbc   : > { %v514_v26 = vpop.f32.mrf.mxu2  ;;  %v553_v27 = vpop.f32.mrf.mxu3 }
  0xbd   : > { %v518_v28 = vadd.f32 %v514_v26, %v479_v25 }
  0xbf   : > { %v557_v29 = vadd.f32 %v553_v27, %v518_v28  ;;  %v711_v30 = vpop.f32.mrf.mxu0  ;;  %v745_v31 = vpop.f32.mrf.mxu1 }
  0xc1   : > { %v2805_v32 = vadd.f32 %v592_v22, %v557_v29 }
  0xc4   : > { %v654_v33 = vpop.f32.mrf.mxu2  ;;  %v686_v34 = vpop.f32.mrf.mxu3 }
  0xc5   : > { %v655_v36 = vadd.f32 %v654_v33, %v631_v14 }
  0xc7   : > { %v714_v37 = vpop.f32.mrf.mxu0  ;;  %v748_v38 = vpop.f32.mrf.mxu1  ;;  %v692_v40 = vadd.f32 %v686_v34, %v655_v36 }
  0xc9   : > { %v717_v43 = vadd.f32 %v711_v30, %v692_v40 }
  0xcb   : > { %v751_v47 = vadd.f32 %v745_v31, %v717_v43 }
  0xcc   : > { %v657_v41 = vpop.f32.mrf.mxu2  ;;  %v689_v42 = vpop.f32.mrf.mxu3 }
  0xcd   : > { %v658_v44 = vadd.f32 %v657_v41, %v634_v23 }
  0xcf   : > { %v838_v45 = vpop.f32.mrf.mxu0  ;;  %v872_v46 = vpop.f32.mrf.mxu1  ;;  %v693_v48 = vadd.f32 %v689_v42, %v658_v44 }
  0xd1   : > { %v718_v52 = vadd.f32 %v714_v37, %v693_v48 }
  0xd3   : > { %v752_v56 = vadd.f32 %v748_v38, %v718_v52 }
  0xd4   : > { %v779_v49 = vpop.f32.mrf.mxu2  ;;  %v804_v50 = vpop.f32.mrf.mxu3 }
  0xd5   : > { %v785_v51 = vadd.f32 %v779_v49, %v751_v47 }
  0xd7   : > { %v841_v53 = vpop.f32.mrf.mxu0  ;;  %v810_v54 = vadd.f32 %v804_v50, %v785_v51  ;;  %v875_v55 = vpop.f32.mrf.mxu1 }
  0xd9   : > { %v844_v59 = vadd.f32 %v838_v45, %v810_v54  ;;  %v2274_v54 = vld [vmem:[%s3036_s5 + $0x10] sm:$0xff] }
  0xdb   : > { %v878_v63 = vadd.f32 %v872_v46, %v844_v59 }
  0xdc   : > { %v782_v57 = vpop.f32.mrf.mxu2  ;;  %v807_v58 = vpop.f32.mrf.mxu3 }
  0xdd   : > { %v786_v60 = vadd.f32 %v782_v57, %v752_v56  ;;  %v2819_v6 = vadd.f32 %v2816_v1, %v878_v63 }
  0xdf   : > { %v811_v61 = vadd.f32 %v807_v58, %v786_v60  ;;  %v947_v62 = vpop.f32.mrf.mxu0  ;;  %v981_v3 = vpop.f32.mrf.mxu1  ;;  %v882_v9 = vmax.f32 %v2819_v6, 0.0  ;;  %v2292_v6 = vld [vmem:[%s3036_s5 + $0x30] sm:$0xff] }
  0xe1   : > { %v845_v0 = vadd.f32 %v841_v53, %v811_v61 }
  0xe3   : > { %v879_v2 = vadd.f32 %v875_v55, %v845_v0 }
  0xe4   : > { %v901_v4 = vpop.f32.mrf.mxu2  ;;  %v924_v5 = vpop.f32.mrf.mxu3 }
  0xe5   : > { %v2822_v7 = vadd.f32 %v2816_v1, %v879_v2  ;;  %v925_v15 = vadd.f32 %v924_v5, %v901_v4 }
  0xe7   : > { %v883_v8 = vmax.f32 %v2822_v7, 0.0  ;;  %v950_v10 = vpop.f32.mrf.mxu0  ;;  %v984_v13 = vpop.f32.mrf.mxu1  ;;  %v953_v20 = vadd.f32 %v947_v62, %v925_v15  ;;  %v2275_v62 = vld [vmem:[%s3036_s5 + $0x18] sm:$0xff]  ;;  %v2316_v7 = vld [vmem:[%s3036_s5 + $0x60] sm:$0xff] }
  0xe9   : > { %1640 = vmatpush.msrb.mxu2 %v883_v8  ;;  %v987_v22 = vadd.f32 %v981_v3, %v953_v20 }
  0xeb   : > { %1641 = vmatpush.msrb.mxu2 %v882_v9 }
  0xec   : > { %v904_v11 = vpop.f32.mrf.mxu2  ;;  %v927_v12 = vpop.f32.mrf.mxu3 }
  0xed   : > { %v928_v18 = vadd.f32 %v927_v12, %v904_v11 }
  0xef   : > { %v1083_v14 = vpop.f32.mrf.mxu0  ;;  %v1117_v19 = vpop.f32.mrf.mxu1  ;;  %v954_v21 = vadd.f32 %v950_v10, %v928_v18 }
  0xf1   : > { %v988_v27 = vadd.f32 %v984_v13, %v954_v21 }
  0xf4   : > { %v1015_v16 = vpop.f32.mrf.mxu2  ;;  %v1049_v17 = vpop.f32.mrf.mxu3 }
  0xf5   : > { %v1021_v28 = vadd.f32 %v1015_v16, %v987_v22 }
  0xf7   : > { %v1086_v23 = vpop.f32.mrf.mxu0  ;;  %v1120_v30 = vpop.f32.mrf.mxu1  ;;  %v1055_v31 = vadd.f32 %v1049_v17, %v1021_v28  ;;  %v1424_v28 = vld [vmem:[%s3036_s5] sm:$0xff] }
  0xf9   : > { %v1089_v37 = vadd.f32 %v1083_v14, %v1055_v31 }
  0xfb   : > { %v1123_v40 = vadd.f32 %v1117_v19, %v1089_v37  ;;  %v1456_v37 = vld [vmem:[%s3034_s3] sm:$0xff] }
  0xfc   : > { %v1018_v25 = vpop.f32.mrf.mxu2  ;;  %v1052_v26 = vpop.f32.mrf.mxu3 }
  0xfd   : > { %v1022_v29 = vadd.f32 %v1018_v25, %v988_v27 }
  0xff   : > { %v1056_v33 = vadd.f32 %v1052_v26, %v1022_v29  ;;  %v1203_v34 = vpop.f32.mrf.mxu0  ;;  %v1226_v39 = vpop.f32.mrf.mxu1  ;;  %v602_v29 = vadd.f32 %v2816_v1, %v2805_v32  ;;  %v2284_v32 = vld [vmem:[%s3036_s5 + $0x20] sm:$0xff] }
 0x101   : > { %v1090_v38 = vadd.f32 %v1086_v23, %v1056_v33  ;;  %v604_v31 = vmax.f32 %v602_v29, 0.0 }
 0x103   : > { %v1124_v41 = vadd.f32 %v1120_v30, %v1090_v38  ;;  %v601_v30 = vadd.f32 %v2816_v1, %v2803_v24  ;;  %v2285_v24 = vld [vmem:[%s3036_s5 + $0x28] sm:$0xff] }
 0x104   : > { %v1151_v35 = vpop.f32.mrf.mxu2  ;;  %v1180_v36 = vpop.f32.mrf.mxu3  ;;  %v2301_v38 = vld [vmem:[%s3036_s5 + $0x48] sm:$0xff] }
 0x105   : > { %v1157_v42 = vadd.f32 %v1151_v35, %v1123_v40  ;;  %v1204_v49 = vadd.f32 %v1203_v34, %v1180_v36  ;;  %v603_v33 = vmax.f32 %v601_v30, 0.0  ;;  %v1425_v34 = vld [vmem:[%s3036_s5 + $0x8] sm:$0xff] }
 0x106   : > { %v1457_v35 = vld [vmem:[%s3034_s3 + $0x8] sm:$0xff] }
 0x107   : > { %v1206_v46 = vpop.f32.mrf.mxu0  ;;  %v2831_v47 = vadd.f32 %v2816_v1, %v1157_v42  ;;  %v1229_v51 = vpop.f32.mrf.mxu1  ;;  %v1232_v53 = vadd.f32 %v1226_v39, %v1204_v49  ;;  %1542 = vmatpush.msra.mxu3 %v1457_v35  ;;  %v2317_v40 = vld [vmem:[%s3036_s5 + $0x68] sm:$0xff]  ;;  %v2332_v42 = vld [vmem:[%s3036_s5 + $0x80] sm:$0xff] }
 0x109   : > { %v1161_v52 = vmax.f32 %v2831_v47, 0.0  ;;  %1543 = vmatpush.msra.mxu3 %v1456_v37 }
 0x10c   : > { %v1154_v43 = vpop.f32.mrf.mxu2  ;;  %v1183_v44 = vpop.f32.mrf.mxu3 }
 0x10d   : > { %v1158_v45 = vadd.f32 %v1154_v43, %v1124_v41  ;;  %v1207_v57 = vadd.f32 %v1206_v46, %v1183_v44  ;;  %v2293_v41 = vld [vmem:[%s3036_s5 + $0x38] sm:$0xff]  ;;  %v2308_v43 = vld [vmem:[%s3036_s5 + $0x50] sm:$0xff]  ;;  %v2333_v44 = vld [vmem:[%s3036_s5 + $0x88] sm:$0xff] }
 0x10e   : > { %v2309_v46 = vld [vmem:[%s3036_s5 + $0x58] sm:$0xff] }
 0x10f   : > { %v2834_v48 = vadd.f32 %v2816_v1, %v1158_v45  ;;  %v1319_v59 = vpop.f32.mrf.mxu0  ;;  %v1233_v60 = vadd.f32 %v1229_v51, %v1207_v57  ;;  %v1344_v63 = vpop.f32.mrf.mxu1  ;;  %v2313_v57 = vld [vmem:[%s3034_s3 + $0x58] sm:$0xff] }
 0x111   : > { %v1162_v50 = vmax.f32 %v2834_v48, 0.0  ;;  %v2324_v48 = vld [vmem:[%s3036_s5 + $0x70] sm:$0xff] }
 0x113   : > { %1481 = vmatpush.msrb.mxu1 %v1162_v50 }
 0x114   : > { %v1251_v55 = vpop.f32.mrf.mxu2  ;;  %v1285_v56 = vpop.f32.mrf.mxu3 }
 0x115   : > { %1482 = vmatpush.msrb.mxu1 %v1161_v52  ;;  %v1257_v58 = vadd.f32 %v1251_v55, %v1232_v53  ;;  %v2296_v53 = vld [vmem:[%s3034_s3 + $0x30] sm:$0xff] }
 0x116   : > { %2276 = vmatmul.msk.f32.vlgmr.msrb.gmra.mxu1 %vm1426_vm2, %v2274_v54  ;;  %v2305_v54 = vld [vmem:[%s3034_s3 + $0x48] sm:$0xff] }
 0x117   : > { %v1291_v61 = vadd.f32 %v1285_v56, %v1257_v58  ;;  %v1322_v10 = vpop.f32.mrf.mxu0  ;;  %v1347_v15 = vpop.f32.mrf.mxu1  ;;  %v2304_v56 = vld [vmem:[%s3034_s3 + $0x40] sm:$0xff] }
 0x119   : > { %v1325_v4 = vadd.f32 %v1319_v59, %v1291_v61  ;;  %v2321_v61 = vld [vmem:[%s3034_s3 + $0x68] sm:$0xff] }
 0x11b   : > { %v1350_v11 = vadd.f32 %v1344_v63, %v1325_v4 }
 0x11c   : > { %v1254_v0 = vpop.f32.mrf.mxu2  ;;  %v1288_v2 = vpop.f32.mrf.mxu3 }
 0x11d   : > { %v1258_v3 = vadd.f32 %v1254_v0, %v1233_v60  ;;  %v2312_v60 = vld [vmem:[%s3034_s3 + $0x50] sm:$0xff]  ;;  %v2320_v0 = vld [vmem:[%s3034_s3 + $0x60] sm:$0xff] }
 0x11e   : > { %2277 = vmatmul.msk.f32.gmra.mxu1 %vm1426_vm2, %v2275_v62 }
 0x11f   : > { %v1292_v5 = vadd.f32 %v1288_v2, %v1258_v3  ;;  %v2329_v2 = vld [vmem:[%s3034_s3 + $0x78] sm:$0xff] }
 0x121   : > { %v1326_v14 = vadd.f32 %v1322_v10, %v1292_v5  ;;  %v2328_v5 = vld [vmem:[%s3034_s3 + $0x70] sm:$0xff]  ;;  %v2337_v10 = vld [vmem:[%s3034_s3 + $0x88] sm:$0xff] }
 0x123   : > { %v1351_v17 = vadd.f32 %v1347_v15, %v1326_v14 }
 0x124   : > { %v1378_v12 = vpop.f32.mrf.mxu2  ;;  %v1412_v13 = vpop.f32.mrf.mxu3 }
 0x125   : > { %v1384_v16 = vadd.f32 %v1378_v12, %v1350_v11 }
 0x127   : > { %v1418_v18 = vadd.f32 %v1412_v13, %v1384_v16  ;;  %v2336_v13 = vld [vmem:[%s3034_s3 + $0x80] sm:$0xff] }
 0x129   : > { %v1420_v22 = vadd.f32 %v2816_v1, %v1418_v18 }
 0x12b   : > { %v1422_v26 = vmax.f32 %v1420_v22, 0.0 }
 0x12c   : > { %v1381_v19 = vpop.f32.mrf.mxu2  ;;  %v1415_v20 = vpop.f32.mrf.mxu3 }
 0x12d   : > { %v1385_v21 = vadd.f32 %v1381_v19, %v1351_v17 }
 0x12f   : > { %v1419_v23 = vadd.f32 %v1415_v20, %v1385_v21 }
 0x131   : > { %v1421_v25 = vadd.f32 %v2816_v1, %v1419_v23  ;;  %v2300_v1 = vld [vmem:[%s3036_s5 + $0x40] sm:$0xff] }
 0x133   : > { %v1423_v27 = vmax.f32 %v1421_v25, 0.0 }
 0x135   : > { %1447 = vmatpush.msrb.mxu0 %v1423_v27 }
 0x137   : > { %1448 = vmatpush.msrb.mxu0 %v1422_v26 }
 0x138   : > { %2272 = vmatmul.msk.f32.vlgmr.msrb.gmra.mxu0 %vm1426_vm2, %v1424_v28 }
 0x139   : > { %1574 = vmatpush.msra.mxu0 %v1423_v27 }
 0x13b   : > { %1575 = vmatpush.msra.mxu0 %v1422_v26 }
 0x13d   : > { %1706 = vmatpush.msrb.mxu0 %v604_v31 }
 0x13f   : > { %1707 = vmatpush.msrb.mxu0 %v603_v33 }
 0x140   : > { %2273 = vmatmul.msk.f32.gmra.mxu0 %vm1426_vm2, %v1425_v34 }
 0x148   : > { %2286 = vmatmul.msk.f32.vlgmr.msra.gmra.mxu0 %vm1426_vm2, %v2284_v32 }
 0x149   : > { %1838 = vmatpush.msra.mxu0 %v1423_v27 }
 0x14b   : > { %1839 = vmatpush.msra.mxu0 %v1422_v26 }
 0x150   : > { %2287 = vmatmul.msk.f32.gmra.mxu0 %vm1426_vm2, %v2285_v24 }
 0x158   : > { %2302 = vmatmul.msk.f32.vlgmr.msrb.gmra.mxu0 %vm1426_vm2, %v2300_v1 }
 0x159   : > { %1970 = vmatpush.msrb.mxu0 %v1423_v27 }
 0x15b   : > { %1971 = vmatpush.msrb.mxu0 %v1422_v26 }
 0x160   : > { %2303 = vmatmul.msk.f32.gmra.mxu0 %vm1426_vm2, %v2301_v38 }
 0x168   : > { %2318 = vmatmul.msk.f32.vlgmr.msra.gmra.mxu0 %vm1426_vm2, %v2316_v7 }
 0x170   : > { %2319 = vmatmul.msk.f32.gmra.mxu0 %vm1426_vm2, %v2317_v40 }
 0x178   : > { %2334 = vmatmul.msk.f32.vlgmr.msrb.gmra.mxu0 %vm1426_vm2, %v2332_v42 }
 0x180   : > { %2335 = vmatmul.msk.f32.gmra.mxu0 %vm1426_vm2, %v2333_v44 }
 0x193   : > { %v1484_v36 = vpop.f32.mrf.mxu1 }
 0x194   : > { %2280 = vmatmul.msk.f32.vlgmr.msra.gmra.mxu2 %vm1426_vm2, %v1484_v36 }
 0x195   : > { %1772 = vmatpush.msra.mxu2 %v883_v8  ;;  %v2289_v8 = vld [vmem:[%s3034_s3 + $0x28] sm:$0xff] }
 0x196   : > { %1606 = vmatpush.msra.mxu1 %v2289_v8 }
 0x197   : > { %1773 = vmatpush.msra.mxu2 %v882_v9  ;;  %v2288_v9 = vld [vmem:[%s3034_s3 + $0x20] sm:$0xff] }
 0x198   : > { %1607 = vmatpush.msra.mxu1 %v2288_v9  ;;  %v2391_v9 = vld [vmem:[%s3035_s4] ss:$0 sm:$0xff] }
 0x19a   : > { %1738 = vmatpush.msrb.mxu1 %v2305_v54 }
 0x19b   : > { %v1487_v39 = vpop.f32.mrf.mxu1 }
 0x19c   : > { %2281 = vmatmul.msk.f32.gmra.mxu2 %vm1426_vm2, %v1487_v39  ;;  %1739 = vmatpush.msrb.mxu1 %v2304_v56 }
 0x1a4   : > { %2294 = vmatmul.msk.f32.vlgmr.msrb.gmra.mxu2 %vm1426_vm2, %v2292_v6 }
 0x1a5   : > { %1904 = vmatpush.msrb.mxu2 %v1162_v50  ;;  %v2325_v50 = vld [vmem:[%s3036_s5 + $0x78] sm:$0xff] }
 0x1a7   : > { %1905 = vmatpush.msrb.mxu2 %v1161_v52  ;;  %v2297_v52 = vld [vmem:[%s3034_s3 + $0x38] sm:$0xff] }
 0x1a8   : > { %1672 = vmatpush.msrb.mxu3 %v2297_v52 }
 0x1aa   : > { %1673 = vmatpush.msrb.mxu3 %v2296_v53 }
 0x1ac   : > { %2295 = vmatmul.msk.f32.gmra.mxu2 %vm1426_vm2, %v2293_v41 }
 0x1b4   : > { %2310 = vmatmul.msk.f32.vlgmr.msra.gmra.mxu2 %vm1426_vm2, %v2308_v43 }
 0x1b5   : > { %v1450_v45 = vpop.f32.mrf.mxu0 }
 0x1b6   : > { %2282 = vmatmul.msk.f32.vlgmr.msra.gmra.mxu3 %vm1426_vm2, %v1450_v45 }
 0x1b7   : > { %1804 = vmatpush.msra.mxu3 %v2313_v57 }
 0x1b9   : > { %1805 = vmatpush.msra.mxu3 %v2312_v60 }
 0x1bc   : > { %2311 = vmatmul.msk.f32.gmra.mxu2 %vm1426_vm2, %v2309_v46 }
 0x1bd   : > { %v1453_v47 = vpop.f32.mrf.mxu0 }
 0x1be   : > { %2283 = vmatmul.msk.f32.gmra.mxu3 %vm1426_vm2, %v1453_v47 }
 0x1c4   : > { %2326 = vmatmul.msk.f32.vlgmr.msrb.gmra.mxu2 %vm1426_vm2, %v2324_v48 }
 0x1c5   : > { %v1577_v49 = vpop.f32.mrf.mxu0 }
 0x1c6   : > { %2290 = vmatmul.msk.f32.vlgmr.msra.gmra.mxu1 %vm1426_vm2, %v1577_v49 }
 0x1c7   : > { %1870 = vmatpush.msra.mxu1 %v2321_v61 }
 0x1c9   : > { %1871 = vmatpush.msra.mxu1 %v2320_v0 }
 0x1cc   : > { %2327 = vmatmul.msk.f32.gmra.mxu2 %vm1426_vm2, %v2325_v50 }
 0x1cd   : > { %v1580_v51 = vpop.f32.mrf.mxu0 }
 0x1ce   : > { %2291 = vmatmul.msk.f32.gmra.mxu1 %vm1426_vm2, %v1580_v51 }
 0x1d5   : > { %v1709_v55 = vpop.f32.mrf.mxu0 }
 0x1d6   : > { %2306 = vmatmul.msk.f32.vlgmr.msrb.gmra.mxu1 %vm1426_vm2, %v1709_v55 }
 0x1d7   : > { %2002 = vmatpush.msrb.mxu1 %v2337_v10 }
 0x1d9   : > { %2003 = vmatpush.msrb.mxu1 %v2336_v13 }
 0x1dd   : > { %v1712_v59 = vpop.f32.mrf.mxu0 }
 0x1de   : > { %2307 = vmatmul.msk.f32.gmra.mxu1 %vm1426_vm2, %v1712_v59 }
 0x1e5   : > { %v1841_v63 = vpop.f32.mrf.mxu0 }
 0x1e6   : > { %2322 = vmatmul.msk.f32.vlgmr.msra.gmra.mxu1 %vm1426_vm2, %v1841_v63 }
 0x1ed   : > { %v1844_v4 = vpop.f32.mrf.mxu0 }
 0x1ee   : > { %2323 = vmatmul.msk.f32.gmra.mxu1 %vm1426_vm2, %v1844_v4 }
 0x1f5   : > { %v1973_v12 = vpop.f32.mrf.mxu0 }
 0x1f6   : > { %2338 = vmatmul.msk.f32.vlgmr.msrb.gmra.mxu1 %vm1426_vm2, %v1973_v12 }
 0x1fd   : > { %v1976_v15 = vpop.f32.mrf.mxu0 }
 0x1fe   : > { %2339 = vmatmul.msk.f32.gmra.mxu1 %vm1426_vm2, %v1976_v15 }
 0x217   : > { %v1516_v58 = vpop.f32.mrf.mxu2 }
 0x21f   : > { %v1519_v62 = vpop.f32.mrf.mxu2 }
 0x227   : > { %v1643_v3 = vpop.f32.mrf.mxu2 }
 0x228   : > { %2298 = vmatmul.msk.f32.vlgmr.msrb.gmra.mxu3 %vm1426_vm2, %v1643_v3 }
 0x229   : > { %1936 = vmatpush.msrb.mxu3 %v2329_v2 }
 0x22b   : > { %1937 = vmatpush.msrb.mxu3 %v2328_v5 }
 0x22f   : > { %v1646_v11 = vpop.f32.mrf.mxu2 }
 0x230   : > { %2299 = vmatmul.msk.f32.gmra.mxu3 %vm1426_vm2, %v1646_v11 }
 0x237   : > { %v1775_v14 = vpop.f32.mrf.mxu2 }
 0x238   : > { %2314 = vmatmul.msk.f32.vlgmr.msra.gmra.mxu3 %vm1426_vm2, %v1775_v14 }
 0x239   : > { %v1545_v20 = vpop.f32.mrf.mxu3 }
 0x23a   : > { %v1546_v30 = vadd.f32 %v1545_v20, %v1516_v58 }
 0x23f   : > { %v1778_v16 = vpop.f32.mrf.mxu2 }
 0x240   : > { %2315 = vmatmul.msk.f32.gmra.mxu3 %vm1426_vm2, %v1778_v16 }
 0x241   : > { %v1548_v23 = vpop.f32.mrf.mxu3 }
 0x242   : > { %v1549_v24 = vadd.f32 %v1548_v23, %v1519_v62 }
 0x243   : > { %v1609_v19 = vpop.f32.mrf.mxu1 }
 0x244   : > { %v1615_v31 = vadd.f32 %v1609_v19, %v1546_v30 }
 0x247   : > { %v1907_v17 = vpop.f32.mrf.mxu2 }
 0x248   : > { %2330 = vmatmul.msk.f32.vlgmr.msrb.gmra.mxu3 %vm1426_vm2, %v1907_v17 }
 0x24b   : > { %v1612_v21 = vpop.f32.mrf.mxu1 }
 0x24c   : > { %v1616_v35 = vadd.f32 %v1612_v21, %v1549_v24 }
 0x24f   : > { %v1910_v18 = vpop.f32.mrf.mxu2 }
 0x250   : > { %2331 = vmatmul.msk.f32.gmra.mxu3 %vm1426_vm2, %v1910_v18 }
 0x253   : > { %v1741_v22 = vpop.f32.mrf.mxu1 }
 0x25b   : > { %v1744_v26 = vpop.f32.mrf.mxu1 }
 0x263   : > { %v1873_v28 = vpop.f32.mrf.mxu1 }
 0x26b   : > { %v1876_v33 = vpop.f32.mrf.mxu1 }
 0x273   : > { %v2005_v38 = vpop.f32.mrf.mxu1 }
 0x27b   : > { %v2008_v46 = vpop.f32.mrf.mxu1 }
 0x2ab   : > { %v1675_v25 = vpop.f32.mrf.mxu3 }
 0x2ac   : > { %v1681_v34 = vadd.f32 %v1675_v25, %v1615_v31 }
 0x2ae   : > { %v1747_v1 = vadd.f32 %v1741_v22, %v1681_v34 }
 0x2b3   : > { %v1678_v27 = vpop.f32.mrf.mxu3 }
 0x2b4   : > { %v1682_v37 = vadd.f32 %v1678_v27, %v1616_v35 }
 0x2b6   : > { %v1748_v8 = vadd.f32 %v1744_v26, %v1682_v37 }
 0x2bb   : > { %v1807_v29 = vpop.f32.mrf.mxu3 }
 0x2bc   : > { %v1813_v36 = vadd.f32 %v1807_v29, %v1747_v1 }
 0x2be   : > { %v1879_v39 = vadd.f32 %v1873_v28, %v1813_v36 }
 0x2c3   : > { %v1810_v32 = vpop.f32.mrf.mxu3 }
 0x2c4   : > { %v1814_v40 = vadd.f32 %v1810_v32, %v1748_v8 }
 0x2c6   : > { %v1880_v43 = vadd.f32 %v1876_v33, %v1814_v40 }
 0x2cb   : > { %v1939_v7 = vpop.f32.mrf.mxu3 }
 0x2cc   : > { %v1945_v6 = vadd.f32 %v1939_v7, %v1879_v39 }
 0x2ce   : > { %v2011_v41 = vadd.f32 %v2005_v38, %v1945_v6 }
 0x2d0   : > { %v2017_v42 = vadd.f32 %v2391_v9, %v2011_v41 }
 0x2d2   : > { %v2019_v44 = vmax.f32 %v2017_v42, 0.0 }
 0x2d3   : > { %v1942_v45 = vpop.f32.mrf.mxu3 }
 0x2d4   : > { %2022 = vst.msk [vmem:[%s244_s9] sm:$0xff] %vm2021_vm3, %v2019_v44  ;;  %v1946_v47 = vadd.f32 %v1942_v45, %v1880_v43 }
 0x2d6   : > { %v2012_v48 = vadd.f32 %v2008_v46, %v1946_v47 }
 0x2d8   : > { %v2018_v49 = vadd.f32 %v2391_v9, %v2012_v48 }
 0x2da   : > { %v2020_v50 = vmax.f32 %v2018_v49, 0.0 }
 0x2dc   : > { %2023 = vst.msk [vmem:[%s244_s9 + $0x8] sm:$0xff] %vm2021_vm3, %v2020_v50 }
 0x2dd   : > { %2419 = shalt.err (!%p2416_p3)
}
 0x2de   : > { %s2456_s16 = smov 128   ;;  %s2457_s20 = smov 8  }
 0x2df   : > { %2349 = dma.vmem_to_hbm [thread:$0]  (%p2531_p5), %s2038_s10, 256, %s2040_s11, %s2025_s25, %s2456_s16, %s2456_s16, %s2457_s20  }
 0x2e0 PF: > { %p2355_p4 = scmp.ge.s32.totalorder %s2454_s24, 2  ;;  %s2054_s26 = sand.u32 1, %s2442_s21  }
 0x2e1   : > { %s2055_s28 = scalar_lea.sflag [#allocation3], %s2054_s26 }
 0x2e2   : > { %p2352_p7 = pnand %p2355_p4, %p2535_p6 }
 0x2e4   : > { %p2353_p8 = pneg %p2352_p7 }
 0x2e6   : > { %2437 = dma.done.wait (%p2353_p8), %s2055_s28, 256  }
 0x2e7   : > { %2439 = vsyncadd (%p2353_p8), %s2055_s28, 4294967040  ;;  %p16_p9 = scmp.ge.s32.totalorder %s2518_s27, 4   ;;  %s3040_s21 = smov %s2446_s22 }
 0x2e8   : > { %s3041_s22 = smov %s2450_s23  ;;  %s3042_s23 = smov %s2529_s30 }
 0x2e9   : > { %s3043_s24 = smov %s2518_s27  ;;  %18 = sbr.rel (!%p16_p9) target bundleno = 3 (0x3), region = 127 }
 0x2ee   :  { %2061 = vsyncpa [#allocation3], 1 }
 0x2ef   :  { %2063 = vsyncpa [#allocation3 + $0x1], 1 }

</bundles_post_ra>
